<compile_context>
chip_gen: v6e
topology: v6e:2x2x1
jax: 0.10.0
libtpu: 0.0.40
codegen_flags: <defaults>
</compile_context>

<pallas_src>
import functools

import jax
import jax.numpy as jnp
from jax import lax
from jax.experimental import pallas as pl
from jax.experimental.pallas import tpu as pltpu

EPS = 1e-5
COMPUTE_DTYPE = jnp.bfloat16   # MXU operand dtype; accumulation & BN stay f32.


# ----------------------------------------------------------------------------
# Wrapper-side weight preparation (runs in XLA, once per call / constant-folds)
# ----------------------------------------------------------------------------
def _block_diag_taps(w_hwio, width):
    """(3,3,Cin,Co) -> (9, width*Cin, width*Co).

    Each 3x3 tap's (Cin, Co) matrix is repeated `width` times along the block
    diagonal so that one full-lane matmul of a lane-dense (rows, width*Cin)
    activation slab applies the tap to every spatial column at once and lands
    directly in the lane-dense (rows, width*Co) output layout."""
    kh, kw, cin, co = w_hwio.shape
    eye = jnp.eye(width, dtype=jnp.float32)
    taps = w_hwio.astype(jnp.float32).reshape(kh * kw, cin, co)
    blk = jnp.einsum("ij,tab->tiajb", eye, taps)
    return blk.reshape(kh * kw, width * cin, width * co)


# ----------------------------------------------------------------------------
# In-kernel helpers
# ----------------------------------------------------------------------------
def _group_fold(stats, group, width):
    """Sum lanes within each channel residue class (lane index = w*group + c)
    and leave the per-channel totals broadcast across all `width` groups.

    log2(width) cyclic roll-and-add steps on the XLU; exact, requires `width`
    to be a power of two (asserted in the wrapper)."""
    shift = group
    while shift < group * width:
        stats = stats + pltpu.roll(stats, shift, axis=1)
        shift *= 2
    return stats


def _bn_relu(acc, gamma_l, beta_l, *, group, width):
    """Training-mode BatchNorm (batch stats, biased variance) + ReLU fused
    into one per-lane scale/shift FMA + max.

    `acc`, `gamma_l`, `beta_l` are lane-dense (rows, width*group) with lane
    index = w*group + c, so the statistics stay full-lane-width throughout.
    Single-pass E[x^2]-mean^2 variance (clamped at 0) is fine for the O(1)
    activations here; use Welford/two-pass at production scale."""
    count = acc.shape[0] * width
    stats = jnp.concatenate([jnp.sum(acc, axis=0, keepdims=True),
                             jnp.sum(acc * acc, axis=0, keepdims=True)],
                            axis=0)                       # (2, width*group)
    stats = _group_fold(stats, group, width)
    r = 1.0 / count
    mean = stats[0:1, :] * r
    var = jnp.maximum(stats[1:2, :] * r - mean * mean, 0.0)
    s = gamma_l * lax.rsqrt(var + EPS)
    t = beta_l - mean * s
    return jnp.maximum(acc * s + t, 0.0)


def _conv3x3_lane_dense(pad_ref, wblk_ref, *, N, H, W, Cin, Cout):
    """3x3 same-padding conv on a zero-padded (N, H+2, (W+2)*Cin) bf16 scratch.

    Each tap is one full-lane matmul: (N*H, W*Cin) activation slab (an
    unaligned lane slice of the padded scratch -> compiler emits lane rolls)
    times the (W*Cin, W*Cout) block-diagonal tap weights, f32 accumulation.
    No im2col scratch, no narrow stores; result is already lane-dense."""
    acc = jnp.zeros((N * H, W * Cout), jnp.float32)
    for dy in range(3):
        for dx in range(3):
            tap = pad_ref[:, dy:dy + H, dx * Cin:(dx + W) * Cin]
            tap = tap.reshape(N * H, W * Cin)
            acc = acc + jnp.dot(tap, wblk_ref[dy * 3 + dx],
                                preferred_element_type=jnp.float32)
    return acc


def _double_conv_kernel(x_ref, w1_ref, ga1_ref, be1_ref,
                        w2_ref, ga2_ref, be2_ref,
                        o_ref, xpad_ref, h1pad_ref,
                        *, N, H, W, Cin, Cmid, Cout):
    # ---- conv1 + BN1 + ReLU -------------------------------------------------
    xpad_ref[...] = jnp.zeros_like(xpad_ref)          # single fill -> zero halo
    xpad_ref[:, 1:H + 1, Cin:(W + 1) * Cin] = x_ref[...]
    acc1 = _conv3x3_lane_dense(xpad_ref, w1_ref,
                               N=N, H=H, W=W, Cin=Cin, Cout=Cmid)
    h1 = _bn_relu(acc1, ga1_ref[...], be1_ref[...], group=Cmid, width=W)

    # ---- conv2 + BN2 + ReLU -------------------------------------------------
    h1pad_ref[...] = jnp.zeros_like(h1pad_ref)
    h1pad_ref[:, 1:H + 1, Cmid:(W + 1) * Cmid] = (
        h1.reshape(N, H, W * Cmid).astype(h1pad_ref.dtype))   # single bf16 cast
    acc2 = _conv3x3_lane_dense(h1pad_ref, w2_ref,
                               N=N, H=H, W=W, Cin=Cmid, Cout=Cout)
    h2 = _bn_relu(acc2, ga2_ref[...], be2_ref[...], group=Cout, width=W)

    # ---- single unmasked full-lane store (already (N*H, W*Cout)) ------------
    o_ref[...] = h2


# ----------------------------------------------------------------------------
# Public wrapper
# ----------------------------------------------------------------------------
@jax.jit
def double_conv(x_nchw, w1, b1, g1, be1, w2, b2, g2, be2):
    """x_nchw: (N, Cin, H, W) f32.  w*: (3,3,Cin,Cout) HWIO.  Returns NCHW f32."""
    N, Cin, H, W = x_nchw.shape
    Cmid = w1.shape[3]
    Cout = w2.shape[3]
    del b1, b2  # exactly cancelled by training-mode BN batch-mean subtraction
    assert W > 0 and (W & (W - 1)) == 0, "lane-group fold assumes power-of-two W"

    # Layout plumbing only: NCHW -> lane-dense (N, H, W*Cin) bf16.
    x_lane = (jnp.transpose(x_nchw, (0, 2, 3, 1))
              .reshape(N, H, W * Cin).astype(COMPUTE_DTYPE))
    wblk1 = _block_diag_taps(w1, W).astype(COMPUTE_DTYPE)   # (9, W*Cin,  W*Cmid)
    wblk2 = _block_diag_taps(w2, W).astype(COMPUTE_DTYPE)   # (9, W*Cmid, W*Cout)
    # gamma/beta pre-tiled to the lane layout (lane = w*C + c).
    ga1_l = jnp.tile(g1.astype(jnp.float32).reshape(1, Cmid), (1, W))
    be1_l = jnp.tile(be1.astype(jnp.float32).reshape(1, Cmid), (1, W))
    ga2_l = jnp.tile(g2.astype(jnp.float32).reshape(1, Cout), (1, W))
    be2_l = jnp.tile(be2.astype(jnp.float32).reshape(1, Cout), (1, W))

    vmem = pl.BlockSpec(memory_space=pltpu.MemorySpace.VMEM)
    out2d = pl.pallas_call(
        functools.partial(_double_conv_kernel,
                          N=N, H=H, W=W, Cin=Cin, Cmid=Cmid, Cout=Cout),
        out_shape=jax.ShapeDtypeStruct((N * H, W * Cout), jnp.float32),
        in_specs=[vmem] * 7,
        out_specs=vmem,
        scratch_shapes=[
            pltpu.VMEM((N, H + 2, (W + 2) * Cin), COMPUTE_DTYPE),   # padded x
            pltpu.VMEM((N, H + 2, (W + 2) * Cmid), COMPUTE_DTYPE),  # padded h1
        ],
        compiler_params=pltpu.CompilerParams(
            vmem_limit_bytes=32 * 1024 * 1024),
    )(x_lane, wblk1, ga1_l, be1_l, wblk2, ga2_l, be2_l)

    return jnp.transpose(out2d.reshape(N, H, W, Cout), (0, 3, 1, 2))


# ----------------------------------------------------------------------------
# References
# ----------------------------------------------------------------------------
def _reference(x_nchw, w1, b1, g1, be1, w2, b2, g2, be2,
               compute_dtype=jnp.float32):
    """Pure-JAX reference.  `compute_dtype=bf16` mirrors the kernel's MXU
    operand precision (f32 accumulation); `float32` is the true reference.
    Conv biases included (training-mode BN cancels them)."""
    def conv(x, w, b):
        out = lax.conv_general_dilated(
            x.astype(compute_dtype), w.astype(compute_dtype),
            window_strides=(1, 1), padding=((1, 1), (1, 1)),
            dimension_numbers=("NCHW", "HWIO", "NCHW"),
            preferred_element_type=jnp.float32)
        return out + b.reshape(1, -1, 1, 1)

    def bn_relu(h, g, be):
        mean = jnp.mean(h, axis=(0, 2, 3), keepdims=True)
        var = jnp.mean((h - mean) ** 2, axis=(0, 2, 3), keepdims=True)
        y = (h - mean) * lax.rsqrt(var + EPS)
        y = y * g.reshape(1, -1, 1, 1) + be.reshape(1, -1, 1, 1)
        return jnp.maximum(y, 0.0)

    h = bn_relu(conv(x_nchw, w1, b1), g1, be1)
    return bn_relu(conv(h, w2, b2), g2, be2)


if __name__ == "__main__":
    # DoubleConv(in_channels=4, out_channels=8) -> mid_channels = 8
    N, Cin, H, W = 2, 4, 16, 16
    Cmid, Cout = 8, 8

    key = jax.random.PRNGKey(0)
    keys = jax.random.split(key, 9)
    x = jax.random.normal(keys[0], (N, Cin, H, W), jnp.float32)

    w1 = jax.random.normal(keys[1], (3, 3, Cin, Cmid), jnp.float32) * 0.2   # HWIO
    b1 = jax.random.normal(keys[2], (Cmid,), jnp.float32) * 0.1
    g1 = 1.0 + 0.1 * jax.random.normal(keys[3], (Cmid,), jnp.float32)
    be1 = 0.1 * jax.random.normal(keys[4], (Cmid,), jnp.float32)
    w2 = jax.random.normal(keys[5], (3, 3, Cmid, Cout), jnp.float32) * 0.2  # HWIO
    b2 = jax.random.normal(keys[6], (Cout,), jnp.float32) * 0.1
    g2 = 1.0 + 0.1 * jax.random.normal(keys[7], (Cout,), jnp.float32)
    be2 = 0.1 * jax.random.normal(keys[8], (Cout,), jnp.float32)

    out = double_conv(x, w1, b1, g1, be1, w2, b2, g2, be2)
    out = jax.block_until_ready(out)
    assert out.shape == (N, Cout, H, W), out.shape

    # 1) Tight check vs a reference that mirrors the kernel's bf16 MXU operands.
    ref_mx = _reference(x, w1, b1, g1, be1, w2, b2, g2, be2,
                        compute_dtype=COMPUTE_DTYPE)
    err_mx = float(jnp.max(jnp.abs(out - ref_mx)))
    assert jnp.allclose(out, ref_mx, atol=1e-2, rtol=1e-2), err_mx

    # 2) Loose check vs the true f32 reference, bounding bf16-operand error.
    ref_f32 = _reference(x, w1, b1, g1, be1, w2, b2, g2, be2,
                         compute_dtype=jnp.float32)
    err_f32 = float(jnp.max(jnp.abs(out - ref_f32)))
    assert err_f32 < 0.1, err_f32

    print("KERNEL_OK")
</pallas_src>

<mosaic_0001>
module attributes {stable_mosaic.version = 11 : i64} {
  func.func @_double_conv_kernel(%arg0: memref<2x16x64xbf16, #tpu.memory_space<vmem>>, %arg1: memref<9x64x128xbf16, #tpu.memory_space<vmem>>, %arg2: memref<1x128xf32, #tpu.memory_space<vmem>>, %arg3: memref<1x128xf32, #tpu.memory_space<vmem>>, %arg4: memref<9x128x128xbf16, #tpu.memory_space<vmem>>, %arg5: memref<1x128xf32, #tpu.memory_space<vmem>>, %arg6: memref<1x128xf32, #tpu.memory_space<vmem>>, %arg7: memref<32x128xf32, #tpu.memory_space<vmem>>, %arg8: memref<2x18x72xbf16, #tpu.memory_space<vmem>>, %arg9: memref<2x18x144xbf16, #tpu.memory_space<vmem>>) attributes {dimension_semantics = [], scalar_prefetch = 0 : i64, scratch_operands = 2 : i64, tpu.core_type = #tpu.core_type<tc>} {
    %cst = arith.constant 0.000000e+00 : bf16
    %0 = vector.broadcast %cst : bf16 to vector<2x18x72xbf16>
    %c0 = arith.constant 0 : index
    %c0_0 = arith.constant 0 : index
    %c0_1 = arith.constant 0 : index
    %1 = vector.load %arg8[%c0, %c0_0, %c0_1] : memref<2x18x72xbf16, #tpu.memory_space<vmem>>, vector<2x18x72xbf16>
    tpu.vector_store %arg8[%c0, %c0_0, %c0_1], %0 {strides = array<i32>} : memref<2x18x72xbf16, #tpu.memory_space<vmem>>, vector<2x18x72xbf16>,
    %c0_2 = arith.constant 0 : index
    %c0_3 = arith.constant 0 : index
    %c0_4 = arith.constant 0 : index
    %2 = vector.load %arg0[%c0_2, %c0_3, %c0_4] : memref<2x16x64xbf16, #tpu.memory_space<vmem>>, vector<2x16x64xbf16>
    %c0_5 = arith.constant 0 : index
    %c1 = arith.constant 1 : index
    %c4 = arith.constant 4 : index
    %3 = vector.load %arg8[%c0_5, %c1, %c4] : memref<2x18x72xbf16, #tpu.memory_space<vmem>>, vector<2x16x64xbf16>
    tpu.vector_store %arg8[%c0_5, %c1, %c4], %2 {strides = array<i32>} : memref<2x18x72xbf16, #tpu.memory_space<vmem>>, vector<2x16x64xbf16>,
    %cst_6 = arith.constant 0.000000e+00 : f32
    %4 = vector.broadcast %cst_6 : f32 to vector<32x128xf32>
    %c0_7 = arith.constant 0 : index
    %c0_8 = arith.constant 0 : index
    %c0_9 = arith.constant 0 : index
    %5 = vector.load %arg8[%c0_7, %c0_8, %c0_9] : memref<2x18x72xbf16, #tpu.memory_space<vmem>>, vector<2x16x64xbf16>
    %6 = vector.shape_cast %5 : vector<2x16x64xbf16> to vector<32x64xbf16>
    %c0_10 = arith.constant 0 : index
    %c0_11 = arith.constant 0 : index
    %c0_12 = arith.constant 0 : index
    %7 = vector.load %arg1[%c0_10, %c0_11, %c0_12] : memref<9x64x128xbf16, #tpu.memory_space<vmem>>, vector<1x64x128xbf16>
    %8 = vector.shape_cast %7 : vector<1x64x128xbf16> to vector<64x128xbf16>
    %cst_13 = arith.constant dense<0.000000e+00> : vector<32x128xf32>
    %9 = tpu.matmul %6, %8, %cst_13 {dimension_numbers = #tpu.dot_dimension_numbers<[1], [0], [0], [1], [0, 0, 1, 1], [], []>} : vector<32x64xbf16>, vector<64x128xbf16>, vector<32x128xf32> -> vector<32x128xf32>
    %10 = arith.addf %4, %9 : vector<32x128xf32>
    %c0_14 = arith.constant 0 : index
    %c0_15 = arith.constant 0 : index
    %c4_16 = arith.constant 4 : index
    %11 = vector.load %arg8[%c0_14, %c0_15, %c4_16] : memref<2x18x72xbf16, #tpu.memory_space<vmem>>, vector<2x16x64xbf16>
    %12 = vector.shape_cast %11 : vector<2x16x64xbf16> to vector<32x64xbf16>
    %c1_17 = arith.constant 1 : index
    %c0_18 = arith.constant 0 : index
    %c0_19 = arith.constant 0 : index
    %13 = vector.load %arg1[%c1_17, %c0_18, %c0_19] : memref<9x64x128xbf16, #tpu.memory_space<vmem>>, vector<1x64x128xbf16>
    %14 = vector.shape_cast %13 : vector<1x64x128xbf16> to vector<64x128xbf16>
    %cst_20 = arith.constant dense<0.000000e+00> : vector<32x128xf32>
    %15 = tpu.matmul %12, %14, %cst_20 {dimension_numbers = #tpu.dot_dimension_numbers<[1], [0], [0], [1], [0, 0, 1, 1], [], []>} : vector<32x64xbf16>, vector<64x128xbf16>, vector<32x128xf32> -> vector<32x128xf32>
    %16 = arith.addf %10, %15 : vector<32x128xf32>
    %c0_21 = arith.constant 0 : index
    %c0_22 = arith.constant 0 : index
    %c8 = arith.constant 8 : index
    %17 = vector.load %arg8[%c0_21, %c0_22, %c8] : memref<2x18x72xbf16, #tpu.memory_space<vmem>>, vector<2x16x64xbf16>
    %18 = vector.shape_cast %17 : vector<2x16x64xbf16> to vector<32x64xbf16>
    %c2 = arith.constant 2 : index
    %c0_23 = arith.constant 0 : index
    %c0_24 = arith.constant 0 : index
    %19 = vector.load %arg1[%c2, %c0_23, %c0_24] : memref<9x64x128xbf16, #tpu.memory_space<vmem>>, vector<1x64x128xbf16>
    %20 = vector.shape_cast %19 : vector<1x64x128xbf16> to vector<64x128xbf16>
    %cst_25 = arith.constant dense<0.000000e+00> : vector<32x128xf32>
    %21 = tpu.matmul %18, %20, %cst_25 {dimension_numbers = #tpu.dot_dimension_numbers<[1], [0], [0], [1], [0, 0, 1, 1], [], []>} : vector<32x64xbf16>, vector<64x128xbf16>, vector<32x128xf32> -> vector<32x128xf32>
    %22 = arith.addf %16, %21 : vector<32x128xf32>
    %c0_26 = arith.constant 0 : index
    %c1_27 = arith.constant 1 : index
    %c0_28 = arith.constant 0 : index
    %23 = vector.load %arg8[%c0_26, %c1_27, %c0_28] : memref<2x18x72xbf16, #tpu.memory_space<vmem>>, vector<2x16x64xbf16>
    %24 = vector.shape_cast %23 : vector<2x16x64xbf16> to vector<32x64xbf16>
    %c3 = arith.constant 3 : index
    %c0_29 = arith.constant 0 : index
    %c0_30 = arith.constant 0 : index
    %25 = vector.load %arg1[%c3, %c0_29, %c0_30] : memref<9x64x128xbf16, #tpu.memory_space<vmem>>, vector<1x64x128xbf16>
    %26 = vector.shape_cast %25 : vector<1x64x128xbf16> to vector<64x128xbf16>
    %cst_31 = arith.constant dense<0.000000e+00> : vector<32x128xf32>
    %27 = tpu.matmul %24, %26, %cst_31 {dimension_numbers = #tpu.dot_dimension_numbers<[1], [0], [0], [1], [0, 0, 1, 1], [], []>} : vector<32x64xbf16>, vector<64x128xbf16>, vector<32x128xf32> -> vector<32x128xf32>
    %28 = arith.addf %22, %27 : vector<32x128xf32>
    %c0_32 = arith.constant 0 : index
    %c1_33 = arith.constant 1 : index
    %c4_34 = arith.constant 4 : index
    %29 = vector.load %arg8[%c0_32, %c1_33, %c4_34] : memref<2x18x72xbf16, #tpu.memory_space<vmem>>, vector<2x16x64xbf16>
    %30 = vector.shape_cast %29 : vector<2x16x64xbf16> to vector<32x64xbf16>
    %c4_35 = arith.constant 4 : index
    %c0_36 = arith.constant 0 : index
    %c0_37 = arith.constant 0 : index
    %31 = vector.load %arg1[%c4_35, %c0_36, %c0_37] : memref<9x64x128xbf16, #tpu.memory_space<vmem>>, vector<1x64x128xbf16>
    %32 = vector.shape_cast %31 : vector<1x64x128xbf16> to vector<64x128xbf16>
    %cst_38 = arith.constant dense<0.000000e+00> : vector<32x128xf32>
    %33 = tpu.matmul %30, %32, %cst_38 {dimension_numbers = #tpu.dot_dimension_numbers<[1], [0], [0], [1], [0, 0, 1, 1], [], []>} : vector<32x64xbf16>, vector<64x128xbf16>, vector<32x128xf32> -> vector<32x128xf32>
    %34 = arith.addf %28, %33 : vector<32x128xf32>
    %c0_39 = arith.constant 0 : index
    %c1_40 = arith.constant 1 : index
    %c8_41 = arith.constant 8 : index
    %35 = vector.load %arg8[%c0_39, %c1_40, %c8_41] : memref<2x18x72xbf16, #tpu.memory_space<vmem>>, vector<2x16x64xbf16>
    %36 = vector.shape_cast %35 : vector<2x16x64xbf16> to vector<32x64xbf16>
    %c5 = arith.constant 5 : index
    %c0_42 = arith.constant 0 : index
    %c0_43 = arith.constant 0 : index
    %37 = vector.load %arg1[%c5, %c0_42, %c0_43] : memref<9x64x128xbf16, #tpu.memory_space<vmem>>, vector<1x64x128xbf16>
    %38 = vector.shape_cast %37 : vector<1x64x128xbf16> to vector<64x128xbf16>
    %cst_44 = arith.constant dense<0.000000e+00> : vector<32x128xf32>
    %39 = tpu.matmul %36, %38, %cst_44 {dimension_numbers = #tpu.dot_dimension_numbers<[1], [0], [0], [1], [0, 0, 1, 1], [], []>} : vector<32x64xbf16>, vector<64x128xbf16>, vector<32x128xf32> -> vector<32x128xf32>
    %40 = arith.addf %34, %39 : vector<32x128xf32>
    %c0_45 = arith.constant 0 : index
    %c2_46 = arith.constant 2 : index
    %c0_47 = arith.constant 0 : index
    %41 = vector.load %arg8[%c0_45, %c2_46, %c0_47] : memref<2x18x72xbf16, #tpu.memory_space<vmem>>, vector<2x16x64xbf16>
    %42 = vector.shape_cast %41 : vector<2x16x64xbf16> to vector<32x64xbf16>
    %c6 = arith.constant 6 : index
    %c0_48 = arith.constant 0 : index
    %c0_49 = arith.constant 0 : index
    %43 = vector.load %arg1[%c6, %c0_48, %c0_49] : memref<9x64x128xbf16, #tpu.memory_space<vmem>>, vector<1x64x128xbf16>
    %44 = vector.shape_cast %43 : vector<1x64x128xbf16> to vector<64x128xbf16>
    %cst_50 = arith.constant dense<0.000000e+00> : vector<32x128xf32>
    %45 = tpu.matmul %42, %44, %cst_50 {dimension_numbers = #tpu.dot_dimension_numbers<[1], [0], [0], [1], [0, 0, 1, 1], [], []>} : vector<32x64xbf16>, vector<64x128xbf16>, vector<32x128xf32> -> vector<32x128xf32>
    %46 = arith.addf %40, %45 : vector<32x128xf32>
    %c0_51 = arith.constant 0 : index
    %c2_52 = arith.constant 2 : index
    %c4_53 = arith.constant 4 : index
    %47 = vector.load %arg8[%c0_51, %c2_52, %c4_53] : memref<2x18x72xbf16, #tpu.memory_space<vmem>>, vector<2x16x64xbf16>
    %48 = vector.shape_cast %47 : vector<2x16x64xbf16> to vector<32x64xbf16>
    %c7 = arith.constant 7 : index
    %c0_54 = arith.constant 0 : index
    %c0_55 = arith.constant 0 : index
    %49 = vector.load %arg1[%c7, %c0_54, %c0_55] : memref<9x64x128xbf16, #tpu.memory_space<vmem>>, vector<1x64x128xbf16>
    %50 = vector.shape_cast %49 : vector<1x64x128xbf16> to vector<64x128xbf16>
    %cst_56 = arith.constant dense<0.000000e+00> : vector<32x128xf32>
    %51 = tpu.matmul %48, %50, %cst_56 {dimension_numbers = #tpu.dot_dimension_numbers<[1], [0], [0], [1], [0, 0, 1, 1], [], []>} : vector<32x64xbf16>, vector<64x128xbf16>, vector<32x128xf32> -> vector<32x128xf32>
    %52 = arith.addf %46, %51 : vector<32x128xf32>
    %c0_57 = arith.constant 0 : index
    %c2_58 = arith.constant 2 : index
    %c8_59 = arith.constant 8 : index
    %53 = vector.load %arg8[%c0_57, %c2_58, %c8_59] : memref<2x18x72xbf16, #tpu.memory_space<vmem>>, vector<2x16x64xbf16>
    %54 = vector.shape_cast %53 : vector<2x16x64xbf16> to vector<32x64xbf16>
    %c8_60 = arith.constant 8 : index
    %c0_61 = arith.constant 0 : index
    %c0_62 = arith.constant 0 : index
    %55 = vector.load %arg1[%c8_60, %c0_61, %c0_62] : memref<9x64x128xbf16, #tpu.memory_space<vmem>>, vector<1x64x128xbf16>
    %56 = vector.shape_cast %55 : vector<1x64x128xbf16> to vector<64x128xbf16>
    %cst_63 = arith.constant dense<0.000000e+00> : vector<32x128xf32>
    %57 = tpu.matmul %54, %56, %cst_63 {dimension_numbers = #tpu.dot_dimension_numbers<[1], [0], [0], [1], [0, 0, 1, 1], [], []>} : vector<32x64xbf16>, vector<64x128xbf16>, vector<32x128xf32> -> vector<32x128xf32>
    %58 = arith.addf %52, %57 : vector<32x128xf32>
    %c0_64 = arith.constant 0 : index
    %c0_65 = arith.constant 0 : index
    %59 = vector.load %arg2[%c0_64, %c0_65] : memref<1x128xf32, #tpu.memory_space<vmem>>, vector<1x128xf32>
    %c0_66 = arith.constant 0 : index
    %c0_67 = arith.constant 0 : index
    %60 = vector.load %arg3[%c0_66, %c0_67] : memref<1x128xf32, #tpu.memory_space<vmem>>, vector<1x128xf32>
    %cst_68 = arith.constant dense<0.000000e+00> : vector<128xf32>
    %61 = vector.multi_reduction <add>, %58, %cst_68 [0] : vector<32x128xf32> to vector<128xf32>
    %62 = vector.shape_cast %61 : vector<128xf32> to vector<1x128xf32>
    %63 = arith.mulf %58, %58 : vector<32x128xf32>
    %cst_69 = arith.constant dense<0.000000e+00> : vector<128xf32>
    %64 = vector.multi_reduction <add>, %63, %cst_69 [0] : vector<32x128xf32> to vector<128xf32>
    %65 = vector.shape_cast %64 : vector<128xf32> to vector<1x128xf32>
    %66 = tpu.concatenate %62, %65 in 0 : vector<1x128xf32>, vector<1x128xf32> -> vector<2x128xf32>
    %c8_i32 = arith.constant 8 : i32
    %67 = tpu.dynamic_rotate %66 by %c8_i32 dim 1 : vector<2x128xf32>, i32 -> vector<2x128xf32>
    %68 = arith.addf %66, %67 : vector<2x128xf32>
    %c16_i32 = arith.constant 16 : i32
    %69 = tpu.dynamic_rotate %68 by %c16_i32 dim 1 : vector<2x128xf32>, i32 -> vector<2x128xf32>
    %70 = arith.addf %68, %69 : vector<2x128xf32>
    %c32_i32 = arith.constant 32 : i32
    %71 = tpu.dynamic_rotate %70 by %c32_i32 dim 1 : vector<2x128xf32>, i32 -> vector<2x128xf32>
    %72 = arith.addf %70, %71 : vector<2x128xf32>
    %c64_i32 = arith.constant 64 : i32
    %73 = tpu.dynamic_rotate %72 by %c64_i32 dim 1 : vector<2x128xf32>, i32 -> vector<2x128xf32>
    %74 = arith.addf %72, %73 : vector<2x128xf32>
    %75 = vector.extract_strided_slice %74 {offsets = [0, 0], sizes = [1, 128], strides = [1, 1]} : vector<2x128xf32> to vector<1x128xf32>
    %cst_70 = arith.constant 0.001953125 : f32
    %76 = vector.broadcast %cst_70 : f32 to vector<1x128xf32>
    %77 = arith.mulf %75, %76 : vector<1x128xf32>
    %78 = vector.extract_strided_slice %74 {offsets = [1, 0], sizes = [1, 128], strides = [1, 1]} : vector<2x128xf32> to vector<1x128xf32>
    %cst_71 = arith.constant 0.001953125 : f32
    %79 = vector.broadcast %cst_71 : f32 to vector<1x128xf32>
    %80 = arith.mulf %78, %79 : vector<1x128xf32>
    %81 = arith.mulf %77, %77 : vector<1x128xf32>
    %82 = arith.subf %80, %81 : vector<1x128xf32>
    %cst_72 = arith.constant 0.000000e+00 : f32
    %83 = vector.broadcast %cst_72 : f32 to vector<1x128xf32>
    %84 = arith.maximumf %82, %83 : vector<1x128xf32>
    %cst_73 = arith.constant 9.99999974E-6 : f32
    %85 = vector.broadcast %cst_73 : f32 to vector<1x128xf32>
    %86 = arith.addf %84, %85 : vector<1x128xf32>
    %87 = math.rsqrt %86 : vector<1x128xf32>
    %88 = arith.mulf %59, %87 : vector<1x128xf32>
    %89 = arith.mulf %77, %88 : vector<1x128xf32>
    %90 = arith.subf %60, %89 : vector<1x128xf32>
    %91 = vector.broadcast %88 : vector<1x128xf32> to vector<32x128xf32>
    %92 = arith.mulf %58, %91 : vector<32x128xf32>
    %93 = vector.broadcast %90 : vector<1x128xf32> to vector<32x128xf32>
    %94 = arith.addf %92, %93 : vector<32x128xf32>
    %cst_74 = arith.constant 0.000000e+00 : f32
    %95 = vector.broadcast %cst_74 : f32 to vector<32x128xf32>
    %96 = arith.maximumf %94, %95 : vector<32x128xf32>
    %cst_75 = arith.constant 0.000000e+00 : bf16
    %97 = vector.broadcast %cst_75 : bf16 to vector<2x18x144xbf16>
    %c0_76 = arith.constant 0 : index
    %c0_77 = arith.constant 0 : index
    %c0_78 = arith.constant 0 : index
    %98 = vector.load %arg9[%c0_76, %c0_77, %c0_78] : memref<2x18x144xbf16, #tpu.memory_space<vmem>>, vector<2x18x144xbf16>
    tpu.vector_store %arg9[%c0_76, %c0_77, %c0_78], %97 {strides = array<i32>} : memref<2x18x144xbf16, #tpu.memory_space<vmem>>, vector<2x18x144xbf16>,
    %99 = vector.shape_cast %96 : vector<32x128xf32> to vector<2x16x128xf32>
    %100 = arith.truncf %99 : vector<2x16x128xf32> to vector<2x16x128xbf16>
    %c0_79 = arith.constant 0 : index
    %c1_80 = arith.constant 1 : index
    %c8_81 = arith.constant 8 : index
    %101 = vector.load %arg9[%c0_79, %c1_80, %c8_81] : memref<2x18x144xbf16, #tpu.memory_space<vmem>>, vector<2x16x128xbf16>
    tpu.vector_store %arg9[%c0_79, %c1_80, %c8_81], %100 {strides = array<i32>} : memref<2x18x144xbf16, #tpu.memory_space<vmem>>, vector<2x16x128xbf16>,
    %cst_82 = arith.constant 0.000000e+00 : f32
    %102 = vector.broadcast %cst_82 : f32 to vector<32x128xf32>
    %c0_83 = arith.constant 0 : index
    %c0_84 = arith.constant 0 : index
    %c0_85 = arith.constant 0 : index
    %103 = vector.load %arg9[%c0_83, %c0_84, %c0_85] : memref<2x18x144xbf16, #tpu.memory_space<vmem>>, vector<2x16x128xbf16>
    %104 = vector.shape_cast %103 : vector<2x16x128xbf16> to vector<32x128xbf16>
    %c0_86 = arith.constant 0 : index
    %c0_87 = arith.constant 0 : index
    %c0_88 = arith.constant 0 : index
    %105 = vector.load %arg4[%c0_86, %c0_87, %c0_88] : memref<9x128x128xbf16, #tpu.memory_space<vmem>>, vector<1x128x128xbf16>
    %106 = vector.shape_cast %105 : vector<1x128x128xbf16> to vector<128x128xbf16>
    %cst_89 = arith.constant dense<0.000000e+00> : vector<32x128xf32>
    %107 = tpu.matmul %104, %106, %cst_89 {dimension_numbers = #tpu.dot_dimension_numbers<[1], [0], [0], [1], [0, 0, 1, 1], [], []>} : vector<32x128xbf16>, vector<128x128xbf16>, vector<32x128xf32> -> vector<32x128xf32>
    %108 = arith.addf %102, %107 : vector<32x128xf32>
    %c0_90 = arith.constant 0 : index
    %c0_91 = arith.constant 0 : index
    %c8_92 = arith.constant 8 : index
    %109 = vector.load %arg9[%c0_90, %c0_91, %c8_92] : memref<2x18x144xbf16, #tpu.memory_space<vmem>>, vector<2x16x128xbf16>
    %110 = vector.shape_cast %109 : vector<2x16x128xbf16> to vector<32x128xbf16>
    %c1_93 = arith.constant 1 : index
    %c0_94 = arith.constant 0 : index
    %c0_95 = arith.constant 0 : index
    %111 = vector.load %arg4[%c1_93, %c0_94, %c0_95] : memref<9x128x128xbf16, #tpu.memory_space<vmem>>, vector<1x128x128xbf16>
    %112 = vector.shape_cast %111 : vector<1x128x128xbf16> to vector<128x128xbf16>
    %cst_96 = arith.constant dense<0.000000e+00> : vector<32x128xf32>
    %113 = tpu.matmul %110, %112, %cst_96 {dimension_numbers = #tpu.dot_dimension_numbers<[1], [0], [0], [1], [0, 0, 1, 1], [], []>} : vector<32x128xbf16>, vector<128x128xbf16>, vector<32x128xf32> -> vector<32x128xf32>
    %114 = arith.addf %108, %113 : vector<32x128xf32>
    %c0_97 = arith.constant 0 : index
    %c0_98 = arith.constant 0 : index
    %c16 = arith.constant 16 : index
    %115 = vector.load %arg9[%c0_97, %c0_98, %c16] : memref<2x18x144xbf16, #tpu.memory_space<vmem>>, vector<2x16x128xbf16>
    %116 = vector.shape_cast %115 : vector<2x16x128xbf16> to vector<32x128xbf16>
    %c2_99 = arith.constant 2 : index
    %c0_100 = arith.constant 0 : index
    %c0_101 = arith.constant 0 : index
    %117 = vector.load %arg4[%c2_99, %c0_100, %c0_101] : memref<9x128x128xbf16, #tpu.memory_space<vmem>>, vector<1x128x128xbf16>
    %118 = vector.shape_cast %117 : vector<1x128x128xbf16> to vector<128x128xbf16>
    %cst_102 = arith.constant dense<0.000000e+00> : vector<32x128xf32>
    %119 = tpu.matmul %116, %118, %cst_102 {dimension_numbers = #tpu.dot_dimension_numbers<[1], [0], [0], [1], [0, 0, 1, 1], [], []>} : vector<32x128xbf16>, vector<128x128xbf16>, vector<32x128xf32> -> vector<32x128xf32>
    %120 = arith.addf %114, %119 : vector<32x128xf32>
    %c0_103 = arith.constant 0 : index
    %c1_104 = arith.constant 1 : index
    %c0_105 = arith.constant 0 : index
    %121 = vector.load %arg9[%c0_103, %c1_104, %c0_105] : memref<2x18x144xbf16, #tpu.memory_space<vmem>>, vector<2x16x128xbf16>
    %122 = vector.shape_cast %121 : vector<2x16x128xbf16> to vector<32x128xbf16>
    %c3_106 = arith.constant 3 : index
    %c0_107 = arith.constant 0 : index
    %c0_108 = arith.constant 0 : index
    %123 = vector.load %arg4[%c3_106, %c0_107, %c0_108] : memref<9x128x128xbf16, #tpu.memory_space<vmem>>, vector<1x128x128xbf16>
    %124 = vector.shape_cast %123 : vector<1x128x128xbf16> to vector<128x128xbf16>
    %cst_109 = arith.constant dense<0.000000e+00> : vector<32x128xf32>
    %125 = tpu.matmul %122, %124, %cst_109 {dimension_numbers = #tpu.dot_dimension_numbers<[1], [0], [0], [1], [0, 0, 1, 1], [], []>} : vector<32x128xbf16>, vector<128x128xbf16>, vector<32x128xf32> -> vector<32x128xf32>
    %126 = arith.addf %120, %125 : vector<32x128xf32>
    %c0_110 = arith.constant 0 : index
    %c1_111 = arith.constant 1 : index
    %c8_112 = arith.constant 8 : index
    %127 = vector.load %arg9[%c0_110, %c1_111, %c8_112] : memref<2x18x144xbf16, #tpu.memory_space<vmem>>, vector<2x16x128xbf16>
    %128 = vector.shape_cast %127 : vector<2x16x128xbf16> to vector<32x128xbf16>
    %c4_113 = arith.constant 4 : index
    %c0_114 = arith.constant 0 : index
    %c0_115 = arith.constant 0 : index
    %129 = vector.load %arg4[%c4_113, %c0_114, %c0_115] : memref<9x128x128xbf16, #tpu.memory_space<vmem>>, vector<1x128x128xbf16>
    %130 = vector.shape_cast %129 : vector<1x128x128xbf16> to vector<128x128xbf16>
    %cst_116 = arith.constant dense<0.000000e+00> : vector<32x128xf32>
    %131 = tpu.matmul %128, %130, %cst_116 {dimension_numbers = #tpu.dot_dimension_numbers<[1], [0], [0], [1], [0, 0, 1, 1], [], []>} : vector<32x128xbf16>, vector<128x128xbf16>, vector<32x128xf32> -> vector<32x128xf32>
    %132 = arith.addf %126, %131 : vector<32x128xf32>
    %c0_117 = arith.constant 0 : index
    %c1_118 = arith.constant 1 : index
    %c16_119 = arith.constant 16 : index
    %133 = vector.load %arg9[%c0_117, %c1_118, %c16_119] : memref<2x18x144xbf16, #tpu.memory_space<vmem>>, vector<2x16x128xbf16>
    %134 = vector.shape_cast %133 : vector<2x16x128xbf16> to vector<32x128xbf16>
    %c5_120 = arith.constant 5 : index
    %c0_121 = arith.constant 0 : index
    %c0_122 = arith.constant 0 : index
    %135 = vector.load %arg4[%c5_120, %c0_121, %c0_122] : memref<9x128x128xbf16, #tpu.memory_space<vmem>>, vector<1x128x128xbf16>
    %136 = vector.shape_cast %135 : vector<1x128x128xbf16> to vector<128x128xbf16>
    %cst_123 = arith.constant dense<0.000000e+00> : vector<32x128xf32>
    %137 = tpu.matmul %134, %136, %cst_123 {dimension_numbers = #tpu.dot_dimension_numbers<[1], [0], [0], [1], [0, 0, 1, 1], [], []>} : vector<32x128xbf16>, vector<128x128xbf16>, vector<32x128xf32> -> vector<32x128xf32>
    %138 = arith.addf %132, %137 : vector<32x128xf32>
    %c0_124 = arith.constant 0 : index
    %c2_125 = arith.constant 2 : index
    %c0_126 = arith.constant 0 : index
    %139 = vector.load %arg9[%c0_124, %c2_125, %c0_126] : memref<2x18x144xbf16, #tpu.memory_space<vmem>>, vector<2x16x128xbf16>
    %140 = vector.shape_cast %139 : vector<2x16x128xbf16> to vector<32x128xbf16>
    %c6_127 = arith.constant 6 : index
    %c0_128 = arith.constant 0 : index
    %c0_129 = arith.constant 0 : index
    %141 = vector.load %arg4[%c6_127, %c0_128, %c0_129] : memref<9x128x128xbf16, #tpu.memory_space<vmem>>, vector<1x128x128xbf16>
    %142 = vector.shape_cast %141 : vector<1x128x128xbf16> to vector<128x128xbf16>
    %cst_130 = arith.constant dense<0.000000e+00> : vector<32x128xf32>
    %143 = tpu.matmul %140, %142, %cst_130 {dimension_numbers = #tpu.dot_dimension_numbers<[1], [0], [0], [1], [0, 0, 1, 1], [], []>} : vector<32x128xbf16>, vector<128x128xbf16>, vector<32x128xf32> -> vector<32x128xf32>
    %144 = arith.addf %138, %143 : vector<32x128xf32>
    %c0_131 = arith.constant 0 : index
    %c2_132 = arith.constant 2 : index
    %c8_133 = arith.constant 8 : index
    %145 = vector.load %arg9[%c0_131, %c2_132, %c8_133] : memref<2x18x144xbf16, #tpu.memory_space<vmem>>, vector<2x16x128xbf16>
    %146 = vector.shape_cast %145 : vector<2x16x128xbf16> to vector<32x128xbf16>
    %c7_134 = arith.constant 7 : index
    %c0_135 = arith.constant 0 : index
    %c0_136 = arith.constant 0 : index
    %147 = vector.load %arg4[%c7_134, %c0_135, %c0_136] : memref<9x128x128xbf16, #tpu.memory_space<vmem>>, vector<1x128x128xbf16>
    %148 = vector.shape_cast %147 : vector<1x128x128xbf16> to vector<128x128xbf16>
    %cst_137 = arith.constant dense<0.000000e+00> : vector<32x128xf32>
    %149 = tpu.matmul %146, %148, %cst_137 {dimension_numbers = #tpu.dot_dimension_numbers<[1], [0], [0], [1], [0, 0, 1, 1], [], []>} : vector<32x128xbf16>, vector<128x128xbf16>, vector<32x128xf32> -> vector<32x128xf32>
    %150 = arith.addf %144, %149 : vector<32x128xf32>
    %c0_138 = arith.constant 0 : index
    %c2_139 = arith.constant 2 : index
    %c16_140 = arith.constant 16 : index
    %151 = vector.load %arg9[%c0_138, %c2_139, %c16_140] : memref<2x18x144xbf16, #tpu.memory_space<vmem>>, vector<2x16x128xbf16>
    %152 = vector.shape_cast %151 : vector<2x16x128xbf16> to vector<32x128xbf16>
    %c8_141 = arith.constant 8 : index
    %c0_142 = arith.constant 0 : index
    %c0_143 = arith.constant 0 : index
    %153 = vector.load %arg4[%c8_141, %c0_142, %c0_143] : memref<9x128x128xbf16, #tpu.memory_space<vmem>>, vector<1x128x128xbf16>
    %154 = vector.shape_cast %153 : vector<1x128x128xbf16> to vector<128x128xbf16>
    %cst_144 = arith.constant dense<0.000000e+00> : vector<32x128xf32>
    %155 = tpu.matmul %152, %154, %cst_144 {dimension_numbers = #tpu.dot_dimension_numbers<[1], [0], [0], [1], [0, 0, 1, 1], [], []>} : vector<32x128xbf16>, vector<128x128xbf16>, vector<32x128xf32> -> vector<32x128xf32>
    %156 = arith.addf %150, %155 : vector<32x128xf32>
    %c0_145 = arith.constant 0 : index
    %c0_146 = arith.constant 0 : index
    %157 = vector.load %arg5[%c0_145, %c0_146] : memref<1x128xf32, #tpu.memory_space<vmem>>, vector<1x128xf32>
    %c0_147 = arith.constant 0 : index
    %c0_148 = arith.constant 0 : index
    %158 = vector.load %arg6[%c0_147, %c0_148] : memref<1x128xf32, #tpu.memory_space<vmem>>, vector<1x128xf32>
    %cst_149 = arith.constant dense<0.000000e+00> : vector<128xf32>
    %159 = vector.multi_reduction <add>, %156, %cst_149 [0] : vector<32x128xf32> to vector<128xf32>
    %160 = vector.shape_cast %159 : vector<128xf32> to vector<1x128xf32>
    %161 = arith.mulf %156, %156 : vector<32x128xf32>
    %cst_150 = arith.constant dense<0.000000e+00> : vector<128xf32>
    %162 = vector.multi_reduction <add>, %161, %cst_150 [0] : vector<32x128xf32> to vector<128xf32>
    %163 = vector.shape_cast %162 : vector<128xf32> to vector<1x128xf32>
    %164 = tpu.concatenate %160, %163 in 0 : vector<1x128xf32>, vector<1x128xf32> -> vector<2x128xf32>
    %c8_i32_151 = arith.constant 8 : i32
    %165 = tpu.dynamic_rotate %164 by %c8_i32_151 dim 1 : vector<2x128xf32>, i32 -> vector<2x128xf32>
    %166 = arith.addf %164, %165 : vector<2x128xf32>
    %c16_i32_152 = arith.constant 16 : i32
    %167 = tpu.dynamic_rotate %166 by %c16_i32_152 dim 1 : vector<2x128xf32>, i32 -> vector<2x128xf32>
    %168 = arith.addf %166, %167 : vector<2x128xf32>
    %c32_i32_153 = arith.constant 32 : i32
    %169 = tpu.dynamic_rotate %168 by %c32_i32_153 dim 1 : vector<2x128xf32>, i32 -> vector<2x128xf32>
    %170 = arith.addf %168, %169 : vector<2x128xf32>
    %c64_i32_154 = arith.constant 64 : i32
    %171 = tpu.dynamic_rotate %170 by %c64_i32_154 dim 1 : vector<2x128xf32>, i32 -> vector<2x128xf32>
    %172 = arith.addf %170, %171 : vector<2x128xf32>
    %173 = vector.extract_strided_slice %172 {offsets = [0, 0], sizes = [1, 128], strides = [1, 1]} : vector<2x128xf32> to vector<1x128xf32>
    %cst_155 = arith.constant 0.001953125 : f32
    %174 = vector.broadcast %cst_155 : f32 to vector<1x128xf32>
    %175 = arith.mulf %173, %174 : vector<1x128xf32>
    %176 = vector.extract_strided_slice %172 {offsets = [1, 0], sizes = [1, 128], strides = [1, 1]} : vector<2x128xf32> to vector<1x128xf32>
    %cst_156 = arith.constant 0.001953125 : f32
    %177 = vector.broadcast %cst_156 : f32 to vector<1x128xf32>
    %178 = arith.mulf %176, %177 : vector<1x128xf32>
    %179 = arith.mulf %175, %175 : vector<1x128xf32>
    %180 = arith.subf %178, %179 : vector<1x128xf32>
    %cst_157 = arith.constant 0.000000e+00 : f32
    %181 = vector.broadcast %cst_157 : f32 to vector<1x128xf32>
    %182 = arith.maximumf %180, %181 : vector<1x128xf32>
    %cst_158 = arith.constant 9.99999974E-6 : f32
    %183 = vector.broadcast %cst_158 : f32 to vector<1x128xf32>
    %184 = arith.addf %182, %183 : vector<1x128xf32>
    %185 = math.rsqrt %184 : vector<1x128xf32>
    %186 = arith.mulf %157, %185 : vector<1x128xf32>
    %187 = arith.mulf %175, %186 : vector<1x128xf32>
    %188 = arith.subf %158, %187 : vector<1x128xf32>
    %189 = vector.broadcast %186 : vector<1x128xf32> to vector<32x128xf32>
    %190 = arith.mulf %156, %189 : vector<32x128xf32>
    %191 = vector.broadcast %188 : vector<1x128xf32> to vector<32x128xf32>
    %192 = arith.addf %190, %191 : vector<32x128xf32>
    %cst_159 = arith.constant 0.000000e+00 : f32
    %193 = vector.broadcast %cst_159 : f32 to vector<32x128xf32>
    %194 = arith.maximumf %192, %193 : vector<32x128xf32>
    %c0_160 = arith.constant 0 : index
    %c0_161 = arith.constant 0 : index
    %195 = vector.load %arg7[%c0_160, %c0_161] : memref<32x128xf32, #tpu.memory_space<vmem>>, vector<32x128xf32>
    tpu.vector_store %arg7[%c0_160, %c0_161], %194 {strides = array<i32>} : memref<32x128xf32, #tpu.memory_space<vmem>>, vector<32x128xf32>,
    return
  }
}

</mosaic_0001>

<bundles_post_ra>
// kernel: double_conv.1
= control target key start
LH: loop header
LB: loop body
LE: loop exit
PB: predicated region body
PF: predicated region fallthrough
CT: control target
= control target key end

     0   :  { %vm39_vm0 = vsmask.f32 256  ;;  %vm40_vm1 = vsmask.f32 4368  ;;  %vm27_vm2 = vcmask 584704   ;;  %v3641_v17 = vmov 0   ;;  %s4412_s0 = inlined_call_operand.vmem [shape: bf16[2,16,64], index: 0, kind: input, shape index: {}]   ;;  %s4413_s1 = inlined_call_operand.vmem [shape: bf16[9,64,128], index: 1, kind: input, shape index: {}]   ;;  %s4414_s4 = inlined_call_operand.vmem [shape: bf16[9,128,128], index: 4, kind: input, shape index: {}]   ;;  %s4415_s2 = inlined_call_operand.vmem [shape: f32[1,128], index: 2, kind: input, shape index: {}]   ;;  %s4416_s3 = inlined_call_operand.vmem [shape: f32[1,128], index: 3, kind: input, shape index: {}]   ;;  %s4417_s5 = inlined_call_operand.vmem [shape: f32[1,128], index: 5, kind: input, shape index: {}]   ;;  %s4418_s6 = inlined_call_operand.vmem [shape: f32[1,128], index: 6, kind: input, shape index: {}]   ;;  %s4419_s7 = inlined_call_operand.vmem [shape: f32[32,128], index: 7, kind: output, shape index: {}]  }
   0x1   :  { %v37_v0 = vld [vmem:[%s4412_s0 + $0x8] sm:$0xf]  ;;  %v35_v1 = vld [vmem:[%s4412_s0] sm:$0xf]  ;;  %v38_v2 = vld [vmem:[%s4412_s0 + $0xc] sm:$0xf] }
   0x2   :  { %v60_v3 = vshrl.u32 %v37_v0, 16  ;;  %v63_v4 = vshll.u32 %v37_v0, 16  ;;  %v43_v5 = vshrl.u32 %v35_v1, 16  ;;  %v46_v6 = vshll.u32 %v35_v1, 16  ;;  %v36_v7 = vld [vmem:[%s4412_s0 + $0x4] sm:$0xf]  ;;  %vm3719_vm3 = vmor %vm39_vm0, %vm40_vm1 }
   0x3   :  { %v68_v8 = vshrl.u32 %v38_v2, 16  ;;  %v71_v9 = vshll.u32 %v38_v2, 16  ;;  %v51_v10 = vshrl.u32 %v36_v7, 16  ;;  %v54_v11 = vshll.u32 %v36_v7, 16  ;;  %v3525_v14 = vld [vmem:[%s4413_s1 + $0x18] sm:$0xff]   ;;  %v3526_v18 = vld [vmem:[%s4413_s1 + $0x10] sm:$0xff]  }
   0x4   :  { %v62_v12 = vrot.slane %v60_v3, 7  ;;  %v45_v13 = vrot.slane %v43_v5, 7  ;;  %32 = vst.msk [vmem:[#allocation2 + $0xc] sm:$0xf] %vm27_vm2, %v3641_v17  ;;  %28 = vst.msk [vmem:[#allocation2] sm:$0xf] %vm27_vm2, %v3641_v17  ;;  %3239 = vmatprep.subr.bf16.mxu1 %v3525_v14 }
   0x5   :  { %v70_v15 = vrot.slane %v68_v8, 7  ;;  %v53_v16 = vrot.slane %v51_v10, 7  ;;  %29 = vst.msk [vmem:[#allocation2 + $0x4] sm:$0xf] %vm27_vm2, %v3641_v17  ;;  %33 = vst.msk [vmem:[#allocation2 + $0x10] sm:$0xf] %vm27_vm2, %v3641_v17  ;;  %3240 = vmatpush3.bf16.msra.mxu1 %v3525_v14 }
   0x6   :  { %v65_v19 = vor.u32 %v63_v4, %v62_v12  ;;  %v66_v20 = vrot.slane %v62_v12, 4  ;;  %v48_v21 = vor.u32 %v46_v6, %v45_v13  ;;  %v49_v22 = vrot.slane %v45_v13, 4  ;;  %s3642_s12 = smov 4   ;;  %3241 = vmatprep.subr.bf16.mxu1 %v3526_v18  ;;  %v3527_v28 = vld [vmem:[%s4413_s1 + $0x8] sm:$0xff]   ;;  %v3528_v31 = vld [vmem:[%s4413_s1] sm:$0xff]   ;;  %v3738_v32 = vld [vmem:[%s4413_s1 + $0x78] sm:$0xff]  }
   0x7   :  { %v73_v24 = vor.u32 %v71_v9, %v70_v15  ;;  %v56_v25 = vor.u32 %v54_v11, %v53_v16  ;;  %vm30_vm4 = vcmask 581632   ;;  %v75_v29 = vrot.slane %v70_v15, 4  ;;  %v3535_v33 = vld [vmem:[%s4413_s1 + $0x38] sm:$0xff]   ;;  %v3536_v34 = vld [vmem:[%s4413_s1 + $0x30] sm:$0xff]   ;;  %v3537_v35 = vld [vmem:[%s4413_s1 + $0x28] sm:$0xff]   ;;  %s3643_s29 = smov 124  }
   0x8   :  { %82 = vrot.lane.b32.xlu1 %v65_v19, %s3642_s12  ;;  %76 = vrot.lane.b32.xlu0 %v48_v21, %s3642_s12  ;;  %34 = vst.msk [vmem:[#allocation2 + $0x14] sm:$0x1] %vm30_vm4, %v3641_v17  ;;  %31 = vst.msk [vmem:[#allocation2 + $0x8] sm:$0x1] %vm30_vm4, %v3641_v17  ;;  %v58_v30 = vrot.slane %v53_v16, 4  ;;  %v3538_v36 = vld [vmem:[%s4413_s1 + $0x20] sm:$0xff]  }
   0x9   :  { %v74_v26 = vsel %vm3719_vm3, %v66_v20, %v73_v24  ;;  %v57_v27 = vsel %vm3719_vm3, %v49_v22, %v56_v25  ;;  %3242 = vmatpush3.bf16.msra.mxu1 %v3526_v18  ;;  %3227 = vmatprep.subr.bf16.mxu0 %v3535_v33  ;;  %vm94_vm5 = vcmask 551968   ;;  %vm95_vm6 = vsmask.f32 7938  ;;  %v3758_v43 = vld [vmem:[%s4413_s1 + $0x58] sm:$0xff]   ;;  %v3532_v0 = vld [vmem:[%s4413_s1 + $0x70] sm:$0xff]   ;;  %s3644_s9 = smov 120  }
   0xa   :  { %3243 = vmatprep.subr.bf16.mxu1 %v3527_v28  ;;  %3228 = vmatpush3.bf16.msra.mxu0 %v3535_v33  ;;  %vm96_vm7 = vmand %vm94_vm5, %vm95_vm6  ;;  %vm102_vm8 = vcmask 548896   ;;  %vm173_vm10 = vcmask 523264   ;;  %vm410_vm11 = vsmask.f32 3328  ;;  %vm411_vm12 = vsmask.f32 7440 }
   0xb   :  { %3229 = vmatprep.subr.bf16.mxu0 %v3536_v34  ;;  %v107_v37 = vld [vmem:[#allocation2 + $0xc] sm:$0xf]  ;;  %v97_v38 = vld [vmem:[#allocation2] sm:$0xf]  ;;  %vm103_vm9 = vmand %vm102_vm8, %vm39_vm0  ;;  %vm759_vm14 = vcmask 1042432   ;;  %vm760_vm15 = vcmask 1046532  }
   0xc   :  { %84 = vrot.lane.b32.xlu1 %v74_v26, %s3642_s12  ;;  %78 = vrot.lane.b32.xlu0 %v57_v27, %s3642_s12  ;;  %v3533_v14 = vld [vmem:[%s4413_s1 + $0x68] sm:$0xff]   ;;  %vm3787_vm13 = vmor %vm410_vm11, %vm411_vm12  ;;  %vm1090_vm2 = vcmask 1040384   ;;  %vm1162_vm4 = vcmask 126980   ;;  %s3646_s13 = smov 16   ;;  %s3647_s14 = smov 32   ;;  %vm1158_vm8 = vcmask 130052  }
   0xd   :  { %3244 = vmatpush3.bf16.msra.mxu1 %v3527_v28  ;;  %vm3812_vm1 = vmor %vm759_vm14, %vm760_vm15  ;;  %s3648_s15 = smov 64   ;;  %v3582_v23 = vld [vmem:[%s4414_s4 + $0x70] sm:$0xff]   ;;  %vm1248_vm11 = vsmask.f32 7954  ;;  %vm1232_vm15 = vcmask 64512   ;;  %s3650_s16 = smov 112  }
   0xe   :  { %3245 = vmatprep.subr.bf16.mxu1 %v3528_v31  ;;  %3230 = vmatpush3.bf16.msra.mxu0 %v3536_v34  ;;  %v3592_v20 = vld [vmem:[%s4414_s4 + $0x168] sm:$0xff]  }
   0xf   :  { %3231 = vmatprep.subr.bf16.mxu0 %v3537_v35  ;;  %v111_v46 = vld [vmem:[#allocation2 + $0x14] sm:$0x1]  ;;  %v104_v47 = vld [vmem:[#allocation2 + $0x8] sm:$0x1] }
  0x10   :  { %86 = vrot.lane.b32.xlu1 %v75_v29, %s3642_s12  ;;  %80 = vrot.lane.b32.xlu0 %v58_v30, %s3642_s12 }
  0x11   :  { %3246 = vmatpush3.bf16.msra.mxu1 %v3528_v31  ;;  %v3534_v31 = vld [vmem:[%s4413_s1 + $0x60] sm:$0xff]  }
  0x12   :  { %3263 = vmatprep.subr.bf16.mxu1 %v3738_v32  ;;  %3232 = vmatpush3.bf16.msra.mxu0 %v3537_v35 }
  0x13   :  { %3233 = vmatprep.subr.bf16.mxu0 %v3538_v36 }
  0x16   :  { %3234 = vmatpush3.bf16.msra.mxu0 %v3538_v36 }
  0x17   :  { %3251 = vmatprep.subr.bf16.mxu0 %v3758_v43 }
  0x7a   :  { %v83_v39 = vpop.permute.xlu1 %82  ;;  %v77_v40 = vpop.permute.xlu0 %76 }
  0x7b   :  { %v108_v41 = vsel %vm96_vm7, %v83_v39, %v107_v37  ;;  %v98_v42 = vsel %vm96_vm7, %v77_v40, %v97_v38  ;;  %vm1157_vm7 = vcmask 1043456  }
  0x7c   :  { %109 = vst [vmem:[#allocation2 + $0xc] sm:$0xf] %v108_v41  ;;  %99 = vst [vmem:[#allocation2] sm:$0xf] %v98_v42  ;;  %v3539_v42 = vld [vmem:[%s4413_s1 + $0xb8] sm:$0xff]  }
  0x7e   :  { %v85_v44 = vpop.permute.xlu1 %84  ;;  %v79_v45 = vpop.permute.xlu0 %78 }
  0x7f   :  { %110 = vst.msk [vmem:[#allocation2 + $0x10] sm:$0xf] %vm94_vm5, %v85_v44  ;;  %101 = vst.msk [vmem:[#allocation2 + $0x4] sm:$0xf] %vm94_vm5, %v79_v45  ;;  %v3594_v44 = vld [vmem:[%s4414_s4 + $0x160] sm:$0xff]  }
  0x80   :  { %vm1163_vm5 = vmor %vm1162_vm4, %vm1090_vm2 }
  0x81   :  { %1164 = vst.msk [vmem:[#allocation3 + $0x10] sm:$0x11] %vm1163_vm5, %v3641_v17  ;;  %1167 = vst.msk [vmem:[#allocation3 + $0x28] sm:$0x11] %vm1163_vm5, %v3641_v17  ;;  %vm1258_vm5 = vcmask 1040448  }
  0x82   :  { %v87_v48 = vpop.permute.xlu1 %86  ;;  %v81_v49 = vpop.permute.xlu0 %80 }
  0x83   :  { %v112_v50 = vsel %vm103_vm9, %v87_v48, %v111_v46  ;;  %v105_v51 = vsel %vm103_vm9, %v81_v49, %v104_v47  ;;  %v407_v52 = vld [vmem:[#allocation2 + $0xc] sm:$0xf]  ;;  %v404_v55 = vld [vmem:[#allocation2] sm:$0xf]  ;;  %vm1159_vm9 = vmor %vm1158_vm8, %vm1157_vm7  ;;  %vm1260_vm7 = vcmask 61444  }
  0x84   :  { %113 = vst [vmem:[#allocation2 + $0x14] sm:$0x1] %v112_v50  ;;  %106 = vst [vmem:[#allocation2 + $0x8] sm:$0x1] %v105_v51  ;;  %v438_v53 = vshrl.u32 %v407_v52, 16  ;;  %v441_v54 = vshll.u32 %v407_v52, 16 }
  0x85   :  { %v414_v56 = vshrl.u32 %v404_v55, 16  ;;  %v417_v57 = vshll.u32 %v404_v55, 16  ;;  %v752_v39 = vld [vmem:[#allocation2 + $0xc] sm:$0xe]  ;;  %v751_v45 = vld [vmem:[#allocation2] sm:$0xe] }
  0x86   :  { %v3530_v58 = vld [vmem:[#allocation2 + $0xc] sm:$0xff]   ;;  %v440_v59 = vrot.slane %v438_v53, 4  ;;  %v3531_v60 = vld [vmem:[#allocation2] sm:$0xff]   ;;  %v443_v62 = vrot.slane %v441_v54, 5  ;;  %v2808_v46 = vrot.slane %v752_v39, 9  ;;  %v2807_v50 = vrot.slane %v751_v45, 9 }
  0x87   :  { %v3764_v61 = vld [vmem:[#allocation2 + $0x10] sm:$0xf]  ;;  %v3766_v63 = vld [vmem:[#allocation2 + $0x4] sm:$0xf]  ;;  %147 = vrot.lane.b32.xlu1 %v3530_v58, %s3643_s29  ;;  %v416_v3 = vrot.slane %v414_v56, 4  ;;  %v419_v4 = vrot.slane %v417_v57, 5  ;;  %145 = vrot.lane.b32.xlu0 %v3531_v60, %s3643_s29 }
  0x88   :  { %v447_v1 = vshll.u32 %v3764_v61, 16  ;;  %v451_v2 = vshrl.u32 %v3764_v61, 16  ;;  %3247 = vmatprep.mubr.msk.bf16.mxu1 %vm173_vm10, %v3531_v60  ;;  %v444_v5 = vor.u32 %v443_v62, %v440_v59  ;;  %v423_v6 = vshll.u32 %v3766_v63, 16  ;;  %v3541_v52 = vld [vmem:[%s4413_s1 + $0xb0] sm:$0xff]   ;;  %v3543_v56 = vld [vmem:[%s4413_s1 + $0xa8] sm:$0xff]   ;;  %v3545_v57 = vld [vmem:[%s4413_s1 + $0xa0] sm:$0xff]  }
  0x89   :  { %v427_v7 = vshrl.u32 %v3766_v63, 16  ;;  %3248 = vmatmul.mubr.msk.bf16.vlgmr.msra.gmra.mxu1 %vm173_vm10, %v3530_v58  ;;  %v420_v10 = vor.u32 %v419_v4, %v416_v3  ;;  %v764_v37 = vrot.slane %v3766_v63, 5  ;;  %v3544_v63 = vld [vmem:[%s4413_s1 + $0x48] sm:$0xff]   ;;  %1160 = vst.msk [vmem:[#allocation3] sm:$0xff] %vm1159_vm9, %v3641_v17  ;;  %1161 = vst.msk [vmem:[#allocation3 + $0x8] sm:$0xff] %vm1159_vm9, %v3641_v17 }
  0x8a   :  { %v449_v8 = vrot.slane %v447_v1, 5  ;;  %v453_v9 = vrot.slane %v451_v2, 4  ;;  %3264 = vmatpush3.bf16.msra.mxu1 %v3738_v32  ;;  %v425_v13 = vrot.slane %v423_v6, 5  ;;  %v445_v15 = vrot.slane %v444_v5, 4  ;;  %v3546_v1 = vld [vmem:[%s4413_s1 + $0x40] sm:$0xff]   ;;  %v3549_v6 = vld [vmem:[%s4413_s1 + $0xf0] sm:$0xff]  }
  0x8b   :  { %v409_v11 = vld [vmem:[#allocation2 + $0x14] sm:$0x1]  ;;  %v406_v12 = vld [vmem:[#allocation2 + $0x8] sm:$0x1]  ;;  %319 = vrot.lane.b32.xlu1 %v3530_v58, %s3644_s9  ;;  %3265 = vmatprep.subr.bf16.mxu1 %v3532_v0  ;;  %v429_v19 = vrot.slane %v427_v7, 4  ;;  %v421_v25 = vrot.slane %v420_v10, 4  ;;  %v765_v54 = vsel %vm3812_vm1, %v2807_v50, %v764_v37 }
  0x8c   :  { %v454_v16 = vor.u32 %v453_v9, %v449_v8  ;;  %v457_v18 = vshll.u32 %v409_v11, 16  ;;  %317 = vrot.lane.b32.xlu0 %v3531_v60, %s3644_s9  ;;  %v433_v21 = vshll.u32 %v406_v12, 16  ;;  %v450_v28 = vsel %vm3787_vm13, %v445_v15, %v449_v8  ;;  %v3547_v58 = vld [vmem:[%s4413_s1 + $0xf8] sm:$0xff]   ;;  %v3550_v7 = vld [vmem:[%s4413_s1 + $0x90] sm:$0xff]   ;;  %v3551_v9 = vld [vmem:[%s4413_s1 + $0xe8] sm:$0xff]   ;;  %1165 = vst.msk [vmem:[#allocation3 + $0x18] sm:$0xff] %vm1159_vm9, %v3641_v17 }
  0x8d   :  { %v430_v26 = vor.u32 %v429_v19, %v425_v13  ;;  %v771_v32 = vrot.slane %v3764_v61, 5  ;;  %v426_v34 = vsel %vm3787_vm13, %v421_v25, %v425_v13  ;;  %v774_v36 = vrot.slane %v409_v11, 5  ;;  %v3542_v61 = vld [vmem:[%s4413_s1 + $0x50] sm:$0xff]   ;;  %v3552_v10 = vld [vmem:[%s4413_s1 + $0x88] sm:$0xff]   ;;  %v3553_v11 = vld [vmem:[%s4413_s1 + $0xe0] sm:$0xff]   ;;  %1166 = vst.msk [vmem:[#allocation3 + $0x20] sm:$0xff] %vm1159_vm9, %v3641_v17 }
  0x8e   :  { %v455_v22 = vrot.slane %v454_v16, 4  ;;  %v459_v24 = vrot.slane %v457_v18, 5  ;;  %3266 = vmatpush3.bf16.msra.mxu1 %v3532_v0  ;;  %v435_v27 = vrot.slane %v433_v21, 5  ;;  %v767_v41 = vrot.slane %v406_v12, 5  ;;  %v3554_v12 = vld [vmem:[%s4413_s1 + $0x80] sm:$0xff]   ;;  %v3555_v13 = vld [vmem:[%s4413_s1 + $0xd8] sm:$0xff]   ;;  %vm4063_vm9 = vmand %vm1258_vm5, %vm39_vm0 }
  0x8f   :  { %3267 = vmatprep.subr.bf16.mxu1 %v3533_v14  ;;  %v431_v30 = vrot.slane %v430_v26, 4  ;;  %v773_v40 = vrot.slane %v771_v32, 4  ;;  %v766_v48 = vrot.slane %v764_v37, 4  ;;  %v772_v49 = vsel %vm3812_vm1, %v2808_v46, %v771_v32  ;;  %v3557_v16 = vld [vmem:[%s4413_s1 + $0xc8] sm:$0xff]   ;;  %v3558_v18 = vld [vmem:[%s4413_s1 + $0xc0] sm:$0xff]   ;;  %v3559_v19 = vld [vmem:[%s4413_s1 + $0x118] sm:$0xff]  }
  0x90   :  { %v460_v29 = vsel %vm3787_vm13, %v455_v22, %v459_v24  ;;  %v3560_v21 = vld [vmem:[%s4413_s1 + $0x110] sm:$0xff]   ;;  %v3561_v24 = vld [vmem:[%s4413_s1 + $0x108] sm:$0xff]   ;;  %v3562_v25 = vld [vmem:[%s4413_s1 + $0x100] sm:$0xff]   ;;  %vm1261_vm8 = vsmask.f32 4352 }
  0x91   :  { %v2772_v33 = vcombine.low %v450_v28, %v460_v29  ;;  %v436_v35 = vsel %vm3787_vm13, %v431_v30, %v435_v27  ;;  %v775_v47 = vsel %vm3812_vm1, %v773_v40, %v774_v36  ;;  %v768_v51 = vsel %vm3812_vm1, %v766_v48, %v767_v41 }
  0x92   :  { %3268 = vmatpush3.bf16.msra.mxu1 %v3533_v14  ;;  %v2771_v38 = vcombine.low %v426_v34, %v436_v35  ;;  %v3827_v53 = vcombine.low %v772_v49, %v775_v47  ;;  %v3834_v55 = vcombine.low %v765_v54, %v768_v51  ;;  %v3556_v14 = vld [vmem:[%s4413_s1 + $0xd0] sm:$0xff]  }
  0x93   :  { %570 = vrot.lane.b32.xlu1 %v2772_v33, %s3643_s29  ;;  %3269 = vmatprep.subr.bf16.mxu1 %v3534_v31 }
  0x94   :  { %568 = vrot.lane.b32.xlu0 %v2771_v38, %s3643_s29  ;;  %3271 = vmatprep.mubr.msk.bf16.mxu1 %vm173_vm10, %v2771_v38 }
  0x96   :  { %3270 = vmatpush3.bf16.msra.mxu1 %v3534_v31 }
  0x97   :  { %666 = vrot.lane.b32.xlu1 %v2772_v33, %s3644_s9  ;;  %3287 = vmatprep.subr.bf16.mxu1 %v3539_v42 }
  0x98   :  { %664 = vrot.lane.b32.xlu0 %v2771_v38, %s3644_s9 }
  0x99   :  { %3272 = vmatmul.mubr.msk.bf16.vlgmr.msra.gmra.mxu1 %vm173_vm10, %v2772_v33 }
  0x9a   :  { %3288 = vmatpush3.bf16.msra.mxu1 %v3539_v42 }
  0x9b   :  { %885 = vrot.lane.b32.xlu1 %v3827_v53, %s3643_s29  ;;  %3289 = vmatprep.subr.bf16.mxu1 %v3541_v52 }
  0x9c   :  { %883 = vrot.lane.b32.xlu0 %v3834_v55, %s3643_s29 }
  0x9e   :  { %3290 = vmatpush3.bf16.msra.mxu1 %v3541_v52 }
  0x9f   :  { %981 = vrot.lane.b32.xlu1 %v3827_v53, %s3644_s9  ;;  %3291 = vmatprep.subr.bf16.mxu1 %v3543_v56 }
  0xa0   :  { %979 = vrot.lane.b32.xlu0 %v3834_v55, %s3644_s9 }
  0xa2   :  { %3292 = vmatpush3.bf16.msra.mxu1 %v3543_v56 }
  0xa3   :  { %3293 = vmatprep.subr.bf16.mxu1 %v3545_v57 }
  0xa6   :  { %3294 = vmatpush3.bf16.msra.mxu1 %v3545_v57 }
  0xa7   :  { %3311 = vmatprep.subr.bf16.mxu1 %v3547_v58 }
  0xf9   :  { %v148_v59 = vpop.permute.xlu1 %147  ;;  %v146_v60 = vpop.permute.xlu0 %145 }
  0xfa   :  { %3235 = vmatprep.mubr.msk.bf16.mxu0 %vm173_vm10, %v146_v60 }
  0xfb   :  { %3236 = vmatmul.mubr.msk.bf16.vlgmr.msra.gmra.mxu0 %vm173_vm10, %v148_v59 }
  0xfc   :  { %3252 = vmatpush3.bf16.msra.mxu0 %v3758_v43  ;;  %v3548_v43 = vld [vmem:[%s4413_s1 + $0x98] sm:$0xff]   ;;  %s3645_s1 = smov 8  }
  0xfd   :  { %3253 = vmatprep.subr.bf16.mxu0 %v3542_v61  ;;  %v320_v0 = vpop.permute.xlu1 %319 }
  0xfe   :  { %v318_v62 = vpop.permute.xlu0 %317 }
  0xff   :  { %3259 = vmatprep.mubr.msk.bf16.mxu0 %vm173_vm10, %v318_v62 }
 0x100   :  { %3254 = vmatpush3.bf16.msra.mxu0 %v3542_v61 }
 0x101   :  { %3255 = vmatprep.subr.bf16.mxu0 %v3544_v63 }
 0x104   :  { %3256 = vmatpush3.bf16.msra.mxu0 %v3544_v63 }
 0x105   :  { %v571_v2 = vpop.permute.xlu1 %570  ;;  %3257 = vmatprep.subr.bf16.mxu0 %v3546_v1 }
 0x106   :  { %v569_v3 = vpop.permute.xlu0 %568 }
 0x108   :  { %3258 = vmatpush3.bf16.msra.mxu0 %v3546_v1 }
 0x109   :  { %v667_v4 = vpop.permute.xlu1 %666  ;;  %3275 = vmatprep.subr.bf16.mxu0 %v3548_v43 }
 0x10a   :  { %v665_v5 = vpop.permute.xlu0 %664 }
 0x10b   :  { %3295 = vmatprep.mubr.msk.bf16.mxu1 %vm173_vm10, %v665_v5  ;;  %3260 = vmatmul.mubr.msk.bf16.vlgmr.msra.gmra.mxu0 %vm173_vm10, %v320_v0 }
 0x10c   :  { %3296 = vmatmul.mubr.msk.bf16.vlgmr.msra.gmra.mxu1 %vm173_vm10, %v667_v4  ;;  %3276 = vmatpush3.bf16.msra.mxu0 %v3548_v43 }
 0x10d   :  { %3312 = vmatpush3.bf16.msra.mxu1 %v3547_v58  ;;  %3283 = vmatprep.mubr.msk.bf16.mxu0 %vm173_vm10, %v569_v3  ;;  %v886_v15 = vpop.permute.xlu1 %885 }
 0x10e   :  { %v884_v8 = vpop.permute.xlu0 %883  ;;  %3313 = vmatprep.subr.bf16.mxu1 %v3549_v6  ;;  %3277 = vmatprep.subr.bf16.mxu0 %v3550_v7 }
 0x10f   :  { %3319 = vmatprep.mubr.msk.bf16.mxu1 %vm173_vm10, %v884_v8 }
 0x110   :  { %3278 = vmatpush3.bf16.msra.mxu0 %v3550_v7 }
 0x111   :  { %3314 = vmatpush3.bf16.msra.mxu1 %v3549_v6  ;;  %3279 = vmatprep.subr.bf16.mxu0 %v3552_v10  ;;  %v982_v26 = vpop.permute.xlu1 %981 }
 0x112   :  { %3315 = vmatprep.subr.bf16.mxu1 %v3551_v9  ;;  %v980_v22 = vpop.permute.xlu0 %979 }
 0x114   :  { %3280 = vmatpush3.bf16.msra.mxu0 %v3552_v10 }
 0x115   :  { %3316 = vmatpush3.bf16.msra.mxu1 %v3551_v9  ;;  %3281 = vmatprep.subr.bf16.mxu0 %v3554_v12 }
 0x116   :  { %3317 = vmatprep.subr.bf16.mxu1 %v3553_v11 }
 0x118   :  { %3282 = vmatpush3.bf16.msra.mxu0 %v3554_v12 }
 0x119   :  { %3318 = vmatpush3.bf16.msra.mxu1 %v3553_v11  ;;  %3299 = vmatprep.subr.bf16.mxu0 %v3555_v13 }
 0x11b   :  { %3284 = vmatmul.mubr.msk.bf16.vlgmr.msra.gmra.mxu0 %vm173_vm10, %v571_v2 }
 0x11c   :  { %3320 = vmatmul.mubr.msk.bf16.vlgmr.msra.gmra.mxu1 %vm173_vm10, %v886_v15  ;;  %3300 = vmatpush3.bf16.msra.mxu0 %v3555_v13 }
 0x11d   :  { %3307 = vmatprep.mubr.msk.bf16.mxu0 %vm173_vm10, %v3834_v55  ;;  %3301 = vmatprep.subr.bf16.mxu0 %v3556_v14 }
 0x120   :  { %3302 = vmatpush3.bf16.msra.mxu0 %v3556_v14 }
 0x121   :  { %3303 = vmatprep.subr.bf16.mxu0 %v3557_v16 }
 0x124   :  { %3304 = vmatpush3.bf16.msra.mxu0 %v3557_v16 }
 0x125   :  { %3305 = vmatprep.subr.bf16.mxu0 %v3558_v18 }
 0x128   :  { %3306 = vmatpush3.bf16.msra.mxu0 %v3558_v18 }
 0x129   :  { %3323 = vmatprep.subr.bf16.mxu0 %v3559_v19 }
 0x12b   :  { %3308 = vmatmul.mubr.msk.bf16.vlgmr.msra.gmra.mxu0 %vm173_vm10, %v3827_v53 }
 0x12c   :  { %3324 = vmatpush3.bf16.msra.mxu0 %v3559_v19  ;;  %3331 = vmatprep.mubr.msk.bf16.mxu0 %vm173_vm10, %v980_v22 }
 0x12d   :  { %3325 = vmatprep.subr.bf16.mxu0 %v3560_v21 }
 0x130   :  { %3326 = vmatpush3.bf16.msra.mxu0 %v3560_v21 }
 0x131   :  { %3327 = vmatprep.subr.bf16.mxu0 %v3561_v24 }
 0x134   :  { %3328 = vmatpush3.bf16.msra.mxu0 %v3561_v24 }
 0x135   :  { %3329 = vmatprep.subr.bf16.mxu0 %v3562_v25 }
 0x138   :  { %3330 = vmatpush3.bf16.msra.mxu0 %v3562_v25 }
 0x13b   :  { %3332 = vmatmul.mubr.msk.bf16.vlgmr.msra.gmra.mxu0 %vm173_vm10, %v982_v26  ;;  %vm1247_vm10 = vcmask 64516  }
 0x13c   :  { %vm4038_vm14 = vmand %vm1247_vm10, %vm1248_vm11 }
 0x149   :  { %v3249_v29 = vpop.f32.mrf.mxu1 }
 0x14b   :  { %v293_v31 = vpop.f32.mrf.mxu1 }
 0x14d   :  { %v3250_v33 = vpop.f32.mrf.mxu1 }
 0x14f   :  { %v296_v35 = vpop.f32.mrf.mxu1 }
 0x159   :  { %v3273_v37 = vpop.f32.mrf.mxu1 }
 0x15b   :  { %v540_v39 = vpop.f32.mrf.mxu1 }
 0x15d   :  { %v3274_v41 = vpop.f32.mrf.mxu1 }
 0x15f   :  { %v543_v45 = vpop.f32.mrf.mxu1 }
 0x1bb   :  { %v3237_v27 = vpop.f32.mrf.mxu0 }
 0x1bc   :  { %v302_v54 = vadd.f32 %v3249_v29, %v3237_v27 }
 0x1bd   :  { %v214_v28 = vpop.f32.mrf.mxu0 }
 0x1be   :  { %v294_v51 = vadd.f32 %v293_v31, %v214_v28 }
 0x1bf   :  { %v3238_v30 = vpop.f32.mrf.mxu0 }
 0x1c0   :  { %v305_v57 = vadd.f32 %v3250_v33, %v3238_v30 }
 0x1c1   :  { %v217_v32 = vpop.f32.mrf.mxu0 }
 0x1c2   :  { %v297_v55 = vadd.f32 %v296_v35, %v217_v32 }
 0x1cb   :  { %v3261_v34 = vpop.f32.mrf.mxu0 }
 0x1cc   :  { %v3297_v47 = vpop.f32.mrf.mxu1  ;;  %v402_v58 = vadd.f32 %v3261_v34, %v302_v54 }
 0x1cd   :  { %v385_v36 = vpop.f32.mrf.mxu0 }
 0x1ce   :  { %v732_v49 = vpop.f32.mrf.mxu1  ;;  %v400_v56 = vadd.f32 %v385_v36, %v294_v51  ;;  %v557_v1 = vadd.f32 %v3273_v37, %v402_v58 }
 0x1cf   :  { %v3262_v38 = vpop.f32.mrf.mxu0 }
 0x1d0   :  { %v3298_v52 = vpop.f32.mrf.mxu1  ;;  %v403_v62 = vadd.f32 %v3262_v38, %v305_v57  ;;  %v555_v63 = vadd.f32 %v540_v39, %v400_v56 }
 0x1d1   :  { %v388_v40 = vpop.f32.mrf.mxu0 }
 0x1d2   :  { %v401_v59 = vadd.f32 %v388_v40, %v297_v55  ;;  %v735_v60 = vpop.f32.mrf.mxu1  ;;  %v558_v5 = vadd.f32 %v3274_v41, %v403_v62 }
 0x1d4   :  { %v556_v3 = vadd.f32 %v543_v45, %v401_v59 }
 0x1db   :  { %v3285_v42 = vpop.f32.mrf.mxu0 }
 0x1dc   :  { %v3321_v0 = vpop.f32.mrf.mxu1  ;;  %v653_v4 = vadd.f32 %v3285_v42, %v557_v1 }
 0x1dd   :  { %v636_v46 = vpop.f32.mrf.mxu0 }
 0x1de   :  { %v651_v2 = vadd.f32 %v636_v46, %v555_v63  ;;  %v951_v7 = vpop.f32.mrf.mxu1  ;;  %v749_v11 = vadd.f32 %v3297_v47, %v653_v4  ;;  %v3566_v4 = vld [vmem:[%s4414_s4 + $0x20] sm:$0xff]  }
 0x1df   :  { %v3286_v48 = vpop.f32.mrf.mxu0 }
 0x1e0   :  { %v654_v8 = vadd.f32 %v3286_v48, %v558_v5  ;;  %v747_v9 = vadd.f32 %v732_v49, %v651_v2  ;;  %v3322_v14 = vpop.f32.mrf.mxu1  ;;  %v3563_v2 = vld [vmem:[%s4414_s4 + $0x38] sm:$0xff]  }
 0x1e1   :  { %v639_v50 = vpop.f32.mrf.mxu0  ;;  %3355 = vmatprep.subr.bf16.mxu0 %v3563_v2 }
 0x1e2   :  { %v652_v6 = vadd.f32 %v639_v50, %v556_v3  ;;  %v750_v18 = vadd.f32 %v3298_v52, %v654_v8  ;;  %v954_v25 = vpop.f32.mrf.mxu1  ;;  %v3564_v3 = vld [vmem:[%s4414_s4 + $0x30] sm:$0xff]   ;;  %3356 = vmatpush3.bf16.msra.mxu0 %v3563_v2 }
 0x1e3   :  { %3357 = vmatprep.subr.bf16.mxu0 %v3564_v3 }
 0x1e4   :  { %v748_v13 = vadd.f32 %v735_v60, %v652_v6 }
 0x1e6   :  { %3358 = vmatpush3.bf16.msra.mxu0 %v3564_v3  ;;  %v3569_v3 = vld [vmem:[%s4414_s4 + $0x8] sm:$0xff]  }
 0x1eb   :  { %v3309_v53 = vpop.f32.mrf.mxu0 }
 0x1ec   :  { %v872_v16 = vadd.f32 %v3309_v53, %v749_v11 }
 0x1ed   :  { %v855_v61 = vpop.f32.mrf.mxu0 }
 0x1ee   :  { %v870_v12 = vadd.f32 %v855_v61, %v747_v9  ;;  %v968_v27 = vadd.f32 %v3321_v0, %v872_v16 }
 0x1ef   :  { %v3310_v43 = vpop.f32.mrf.mxu0 }
 0x1f0   :  { %v873_v22 = vadd.f32 %v3310_v43, %v750_v18  ;;  %v966_v24 = vadd.f32 %v951_v7, %v870_v12  ;;  %v3565_v43 = vld [vmem:[%s4414_s4 + $0x28] sm:$0xff]  }
 0x1f1   :  { %v858_v10 = vpop.f32.mrf.mxu0  ;;  %3359 = vmatprep.subr.bf16.mxu0 %v3565_v43 }
 0x1f2   :  { %v871_v19 = vadd.f32 %v858_v10, %v748_v13  ;;  %v969_v32 = vadd.f32 %v3322_v14, %v873_v22  ;;  %3360 = vmatpush3.bf16.msra.mxu0 %v3565_v43  ;;  %v3649_v13 = vmov 1966171168   ;;  %v1117_v14 = vlaneseq }
 0x1f3   :  { %3361 = vmatprep.subr.bf16.mxu0 %v3566_v4  ;;  %v1115_v17 = vunpack.c.l.s4 %v3649_v13  ;;  %v3581_v13 = vld [vmem:[%s4414_s4 + $0x78] sm:$0xff]  }
 0x1f4   :  { %v967_v29 = vadd.f32 %v954_v25, %v871_v19  ;;  %v1118_v16 = vshrl.u32 %v1117_v14, 7  ;;  %3335 = vmatprep.subr.bf16.mxu1 %v3581_v13  ;;  %v3584_v14 = vld [vmem:[%s4414_s4 + $0x60] sm:$0xff]  }
 0x1f5   :  { %3336 = vmatpush3.bf16.msra.mxu1 %v3581_v13 }
 0x1f6   :  { %3362 = vmatpush3.bf16.msra.mxu0 %v3566_v4  ;;  %v3972_v25 = vsub.s32 0, %v1118_v16  ;;  %3337 = vmatprep.subr.bf16.mxu1 %v3582_v23 }
 0x1f9   :  { %3338 = vmatpush3.bf16.msra.mxu1 %v3582_v23 }
 0x1fb   :  { %v3333_v15 = vpop.f32.mrf.mxu0 }
 0x1fc   :  { %v3927_v31 = vadd.f32 %v3333_v15, %v968_v27  ;;  %v1116_v15 = vunpack.c.0.s8 %v1115_v17  ;;  %v3583_v17 = vld [vmem:[%s4414_s4 + $0x68] sm:$0xff]  }
 0x1fd   :  { %v1047_v21 = vpop.f32.mrf.mxu0  ;;  %3339 = vmatprep.subr.bf16.mxu1 %v3583_v17 }
 0x1fe   :  { %v3925_v28 = vadd.f32 %v1047_v21, %v966_v24  ;;  %v1079_v38 = vmul.f32 %v3927_v31, %v3927_v31  ;;  %v3966_v18 = vsub.s32 %v1116_v15, %v1118_v16  ;;  %v1066_v24 = vld [vmem:[%s4415_s2] sm:$0x1]  ;;  %3340 = vmatpush3.bf16.msra.mxu1 %v3583_v17  ;;  %v3585_v15 = vld [vmem:[%s4414_s4 + $0x58] sm:$0xff]   ;;  %v3586_v16 = vld [vmem:[%s4414_s4 + $0x50] sm:$0xff]  }
 0x1ff   :  { %v3334_v26 = vpop.f32.mrf.mxu0  ;;  %3341 = vmatprep.subr.bf16.mxu1 %v3584_v14 }
 0x200   :  { %v1077_v34 = vmul.f32 %v3925_v28, %v3925_v28  ;;  %v3933_v35 = vadd.f32 %v3334_v26, %v969_v32 }
 0x201   :  { %v1050_v30 = vpop.f32.mrf.mxu0 }
 0x202   :  { %v3929_v33 = vadd.f32 %v1050_v30, %v967_v29  ;;  %v1080_v41 = vmul.f32 %v3933_v35, %v3933_v35  ;;  %v1067_v29 = vld [vmem:[%s4416_s3] sm:$0x1]  ;;  %3342 = vmatpush3.bf16.msra.mxu1 %v3584_v14 }
 0x203   :  { %3343 = vmatprep.subr.bf16.mxu1 %v3585_v15 }
 0x204   :  { %v1068_v36 = vadd.f32 %v3929_v33, %v3925_v28  ;;  %v1078_v37 = vmul.f32 %v3929_v33, %v3929_v33 }
 0x206   :  { %v1069_v39 = vadd.f32 %v1068_v36, %v3927_v31  ;;  %v1081_v40 = vadd.f32 %v1078_v37, %v1077_v34  ;;  %3344 = vmatpush3.bf16.msra.mxu1 %v3585_v15 }
 0x207   :  { %3345 = vmatprep.subr.bf16.mxu1 %v3586_v16 }
 0x208   :  { %v1070_v42 = vadd.f32 %v1069_v39, %v3933_v35  ;;  %v1082_v45 = vadd.f32 %v1081_v40, %v1079_v38 }
 0x20a   :  { %v1071_v46 = vrot.slane %v1070_v42, 4  ;;  %v1083_v47 = vadd.f32 %v1082_v45, %v1080_v41  ;;  %3346 = vmatpush3.bf16.msra.mxu1 %v3586_v16 }
 0x20c   :  { %v1072_v48 = vadd.f32 %v1071_v46, %v1070_v42  ;;  %v1084_v49 = vrot.slane %v1083_v47, 4 }
 0x20e   :  { %v1073_v50 = vrot.slane %v1072_v48, 2  ;;  %v1085_v51 = vadd.f32 %v1084_v49, %v1083_v47 }
 0x210   :  { %v1074_v52 = vadd.f32 %v1073_v50, %v1072_v48  ;;  %v1086_v53 = vrot.slane %v1085_v51, 2 }
 0x212   :  { %v1075_v54 = vrot.slane %v1074_v52, 1  ;;  %v1087_v55 = vadd.f32 %v1086_v53, %v1085_v51 }
 0x214   :  { %v1088_v56 = vrot.slane %v1087_v55, 1  ;;  %v1076_v57 = vadd.f32 %v1075_v54, %v1074_v52 }
 0x216   :  { %v1089_v58 = vadd.f32 %v1088_v56, %v1087_v55  ;;  %v3568_v56 = vld [vmem:[%s4414_s4 + $0x10] sm:$0xff]  }
 0x218   :  { %v1091_v59 = vsel %vm1090_vm2, %v1076_v57, %v1089_v58 }
 0x219   :  { %1092 = vrot.lane.b32.xlu0 %v1091_v59, %s3645_s1 }
 0x28b   :  { %v1093_v60 = vpop.permute.xlu0 %1092 }
 0x28c   :  { %v1094_v61 = vadd.f32 %v1093_v60, %v1091_v59 }
 0x28e   :  { %1095 = vrot.lane.b32.xlu1 %v1094_v61, %s3646_s13 }
 0x300   :  { %v1096_v62 = vpop.permute.xlu1 %1095 }
 0x301   :  { %v1097_v63 = vadd.f32 %v1096_v62, %v1094_v61 }
 0x303   :  { %1098 = vrot.lane.b32.xlu0 %v1097_v63, %s3647_s14 }
 0x375   :  { %v1099_v0 = vpop.permute.xlu0 %1098 }
 0x376   :  { %v1100_v1 = vadd.f32 %v1099_v0, %v1097_v63 }
 0x378   :  { %1101 = vrot.lane.b32.xlu1 %v1100_v1, %s3648_s15 }
 0x3ea   :  { %v1102_v5 = vpop.permute.xlu1 %1101 }
 0x3eb   :  { %v1103_v6 = vadd.f32 %v1102_v5, %v1100_v1 }
 0x3ed   :  { %v1104_v7 = vmul.f32 0.001953125, %v1103_v6 }
 0x3ef   :  { %v1105_v8 = vmul.f32 %v1104_v7, %v1104_v7 }
 0x3f1   :  { %v1107_v9 = vrot.slane %v1105_v8, 7 }
 0x3f3   :  { %v1109_v10 = vsub.f32 %v1104_v7, %v1107_v9  ;;  %v4003_v9 = vld [vmem:[%s4414_s4 + $0xf8] sm:$0xff]  }
 0x3f5   :  { %v1110_v11 = vmax.f32 %v1109_v10, 0.0 }
 0x3f7   :  { %v1111_v12 = vadd.f32 1e-05, %v1110_v11 }
 0x3f9   :  { %3637 = vrsqrt.f32 %v1111_v12 }
 0x406   :  { %v3638_v19 = vpop.eup %3637 }
 0x407   :  { %v1120_v21 = vrot.slane %v3638_v19, %v3966_v18  ;;  %v3587_v19 = vld [vmem:[%s4414_s4 + $0x48] sm:$0xff]  }
 0x408   :  { %3347 = vmatprep.subr.bf16.mxu1 %v3587_v19 }
 0x409   :  { %v1121_v22 = vcombine.high %v1120_v21, %v1120_v21  ;;  %3348 = vmatpush3.bf16.msra.mxu1 %v3587_v19  ;;  %v3574_v19 = vld [vmem:[%s4414_s4 + $0xf0] sm:$0xff]  }
 0x40b   :  { %v1128_v26 = vrot.slane %v1121_v22, %v3966_v18 }
 0x40d   :  { %v1130_v27 = vmul.f32 %v1128_v26, %v1066_v24  ;;  %v1251_v26 = vld [vmem:[#allocation3] sm:$0xff] }
 0x40f   :  { %v1131_v30 = vmul.f32 %v1130_v27, %v1104_v7  ;;  %v1137_v32 = vrot.slane %v1130_v27, %v3972_v25  ;;  %v3570_v7 = vld [vmem:[%s4414_s4] sm:$0xff]  }
 0x411   :  { %v1132_v34 = vsub.f32 %v1067_v29, %v1131_v30  ;;  %v1139_v36 = vmul.f32 %v1137_v32, %v3925_v28  ;;  %v1140_v38 = vmul.f32 %v1137_v32, %v3929_v33  ;;  %v1141_v39 = vmul.f32 %v1137_v32, %v3927_v31  ;;  %v3567_v28 = vld [vmem:[%s4414_s4 + $0x18] sm:$0xff]   ;;  %v3589_v30 = vld [vmem:[%s4414_s4 + $0x40] sm:$0xff]  }
 0x412   :  { %v1142_v40 = vmul.f32 %v1137_v32, %v3933_v35  ;;  %3363 = vmatprep.subr.bf16.mxu0 %v3567_v28  ;;  %3349 = vmatprep.subr.bf16.mxu1 %v3589_v30 }
 0x413   :  { %v1147_v37 = vrot.slane %v1132_v34, %v3972_v25  ;;  %3364 = vmatpush3.bf16.msra.mxu0 %v3567_v28  ;;  %3350 = vmatpush3.bf16.msra.mxu1 %v3589_v30 }
 0x414   :  { %3365 = vmatprep.subr.bf16.mxu0 %v3568_v56 }
 0x415   :  { %v1149_v41 = vadd.f32 %v1147_v37, %v1139_v36  ;;  %v1150_v42 = vadd.f32 %v1147_v37, %v1140_v38  ;;  %v1151_v45 = vadd.f32 %v1147_v37, %v1141_v39  ;;  %v1152_v46 = vadd.f32 %v1147_v37, %v1142_v40  ;;  %v1267_v40 = vld [vmem:[#allocation3 + $0x18] sm:$0xff] }
 0x417   :  { %v1153_v47 = vmax.f32 %v1149_v41, 0.0  ;;  %v1154_v48 = vmax.f32 %v1150_v42, 0.0  ;;  %v1155_v49 = vmax.f32 %v1151_v45, 0.0  ;;  %v1156_v50 = vmax.f32 %v1152_v46, 0.0  ;;  %3366 = vmatpush3.bf16.msra.mxu0 %v3568_v56 }
 0x418   :  { %3367 = vmatprep.subr.bf16.mxu0 %v3569_v3 }
 0x419   :  { %v3079_v51 = vpack.c.bf16 %v1153_v47, %v1153_v47  ;;  %v3080_v52 = vpack.c.bf16 %v1154_v48, %v1154_v48  ;;  %v3081_v53 = vpack.c.bf16 %v1155_v49, %v1155_v49  ;;  %v3082_v33 = vpack.c.bf16 %v1156_v50, %v1156_v50  ;;  %v4074_v48 = vld [vmem:[%s4414_s4 + $0xb8] sm:$0xff]   ;;  %v3575_v47 = vld [vmem:[%s4414_s4 + $0xe8] sm:$0xff]  }
 0x41a   :  { %3375 = vmatprep.subr.bf16.mxu1 %v4074_v48 }
 0x41b   :  { %v1181_v31 = vshrl.u32 %v3079_v51, 16  ;;  %v1189_v54 = vshrl.u32 %v3080_v52, 16  ;;  %v1198_v35 = vshrl.u32 %v3081_v53, 16  ;;  %v1206_v55 = vshrl.u32 %v3082_v33, 16  ;;  %3368 = vmatpush3.bf16.msra.mxu0 %v3569_v3 }
 0x41c   :  { %v1184_v58 = vshll.u32 %v3079_v51, 16  ;;  %v1192_v60 = vshll.u32 %v3080_v52, 16  ;;  %v1209_v2 = vshll.u32 %v3082_v33, 16  ;;  %v1201_v4 = vshll.u32 %v3081_v53, 16  ;;  %3369 = vmatprep.subr.bf16.mxu0 %v3570_v7  ;;  %v1264_v33 = vld [vmem:[#allocation3 + $0x10] sm:$0x11] }
 0x41d   :  { %v1183_v57 = vrot.slane %v1181_v31, 7  ;;  %v1191_v59 = vrot.slane %v1189_v54, 7  ;;  %v1200_v61 = vrot.slane %v1198_v35, 7  ;;  %v1208_v62 = vrot.slane %v1206_v55, 7  ;;  %v1271_v35 = vld [vmem:[#allocation3 + $0x28] sm:$0x11] }
 0x41f   :  { %v1186_v63 = vor.u32 %v1184_v58, %v1183_v57  ;;  %v1187_v0 = vrot.slane %v1183_v57, 4  ;;  %v1194_v1 = vor.u32 %v1192_v60, %v1191_v59  ;;  %v1204_v5 = vrot.slane %v1200_v61, 4  ;;  %3370 = vmatpush3.bf16.msra.mxu0 %v3570_v7 }
 0x420   :  { %v1211_v6 = vor.u32 %v1209_v2, %v1208_v62  ;;  %v1203_v8 = vor.u32 %v1201_v4, %v1200_v61  ;;  %v1196_v11 = vrot.slane %v1191_v59, 4  ;;  %v1213_v12 = vrot.slane %v1208_v62, 4  ;;  %3395 = vmatprep.subr.bf16.mxu0 %v4003_v9 }
 0x421   :  { %1214 = vrot.lane.b32.xlu0 %v1186_v63, %s3645_s1  ;;  %v1195_v43 = vsel %vm3719_vm3, %v1187_v0, %v1194_v1 }
 0x422   :  { %1216 = vrot.lane.b32.xlu1 %v1195_v43, %s3645_s1  ;;  %v1212_v10 = vsel %vm3719_vm3, %v1204_v5, %v1211_v6  ;;  %vm1245_vm3 = vcmask 1043520  }
 0x423   :  { %vm4034_vm12 = vmand %vm1245_vm3, %vm95_vm6 }
 0x424   :  { %vm1250_vm4 = vmor %vm4038_vm14, %vm4034_vm12 }
 0x425   :  { %1220 = vrot.lane.b32.xlu0 %v1203_v8, %s3645_s1  ;;  %vm4049_vm6 = vmor %vm1247_vm10, %vm1245_vm3 }
 0x426   :  { %1222 = vrot.lane.b32.xlu1 %v1212_v10, %s3645_s1  ;;  %vm4067_vm3 = vmand %vm1260_vm7, %vm1261_vm8 }
 0x427   :  { %vm1263_vm0 = vmor %vm4067_vm3, %vm4063_vm9 }
 0x429   :  { %1218 = vrot.lane.b32.xlu0 %v1196_v11, %s3645_s1 }
 0x42a   :  { %1224 = vrot.lane.b32.xlu1 %v1213_v12, %s3645_s1 }
 0x493   :  { %v1215_v24 = vpop.permute.xlu0 %1214 }
 0x494   :  { %v1226_v27 = vrot.slane %v1215_v24, 4  ;;  %v1217_v29 = vpop.permute.xlu1 %1216 }
 0x495   :  { %v1227_v34 = vrot.slane %v1217_v29, 4 }
 0x496   :  { %v1233_v36 = vsel %vm1232_vm15, %v1226_v27, %v1215_v24 }
 0x497   :  { %v1252_v37 = vsel %vm1250_vm4, %v1233_v36, %v1251_v26  ;;  %v1234_v38 = vsel %vm1232_vm15, %v1227_v34, %v1217_v29  ;;  %v1221_v39 = vpop.permute.xlu0 %1220 }
 0x498   :  { %1253 = vst [vmem:[#allocation3] sm:$0xff] %v1252_v37  ;;  %1257 = vst.msk [vmem:[#allocation3 + $0x8] sm:$0xff] %vm4049_vm6, %v1234_v38  ;;  %v1229_v41 = vrot.slane %v1221_v39, 4  ;;  %v1223_v42 = vpop.permute.xlu1 %1222  ;;  %v1868_v50 = vshrl.u32 %v1252_v37, 16  ;;  %v1871_v53 = vshll.u32 %v1252_v37, 16 }
 0x499   :  { %v1230_v46 = vrot.slane %v1223_v42, 4 }
 0x49a   :  { %v1236_v49 = vsel %vm1232_vm15, %v1229_v41, %v1221_v39  ;;  %v4091_v57 = vrot.slane %v1868_v50, 4  ;;  %v4096_v61 = vrot.slane %v1871_v53, 5 }
 0x49b   :  { %v1268_v28 = vsel %vm1250_vm4, %v1236_v49, %v1267_v40  ;;  %v1237_v51 = vsel %vm1232_vm15, %v1230_v46, %v1223_v42  ;;  %v1219_v52 = vpop.permute.xlu0 %1218 }
 0x49c   :  { %1269 = vst [vmem:[#allocation3 + $0x18] sm:$0xff] %v1268_v28  ;;  %1270 = vst.msk [vmem:[#allocation3 + $0x20] sm:$0xff] %vm4049_vm6, %v1237_v51  ;;  %v1228_v31 = vrot.slane %v1219_v52, 4  ;;  %v1225_v54 = vpop.permute.xlu1 %1224  ;;  %v1892_v10 = vshrl.u32 %v1268_v28, 16  ;;  %v1895_v11 = vshll.u32 %v1268_v28, 16  ;;  %v1874_v49 = vor.u32 %v4096_v61, %v4091_v57  ;;  %v3576_v57 = vld [vmem:[%s4414_s4 + $0xe0] sm:$0xff]  }
 0x49d   :  { %v1231_v55 = vrot.slane %v1225_v54, 4 }
 0x49e   :  { %v1235_v56 = vsel %vm1232_vm15, %v1228_v31, %v1219_v52  ;;  %v1894_v29 = vrot.slane %v1892_v10, 4  ;;  %v1897_v38 = vrot.slane %v1895_v11, 5 }
 0x49f   :  { %v1265_v58 = vsel %vm1263_vm0, %v1235_v56, %v1264_v33  ;;  %v1238_v59 = vsel %vm1232_vm15, %v1231_v55, %v1225_v54  ;;  %v4094_v60 = vld [vmem:[#allocation3 + $0x8] sm:$0xff]  ;;  %v1681_v2 = vld [vmem:[#allocation3] sm:$0xf] }
 0x4a0   :  { %1266 = vst [vmem:[#allocation3 + $0x10] sm:$0x11] %v1265_v58  ;;  %v1272_v62 = vsel %vm1263_vm0, %v1238_v59, %v1271_v35  ;;  %v2874_v63 = vcombine.high %v1252_v37, %v4094_v60  ;;  %v2873_v0 = vcombine.low %v1252_v37, %v4094_v60  ;;  %v3571_v1 = vld [vmem:[#allocation3] ss:$8 sps:$4 sm:$0xff]   ;;  %v1688_v43 = vshrl.u32 %v1681_v2, 16 }
 0x4a1   :  { %v4100_v3 = vld [vmem:[#allocation3 + $0x8] sm:$0xf]  ;;  %1273 = vst [vmem:[#allocation3 + $0x28] sm:$0x11] %v1272_v62  ;;  %v1691_v4 = vshll.u32 %v1681_v2, 16  ;;  %v1877_v7 = vshll.u32 %v4094_v60, 16  ;;  %3371 = vmatprep.mubr.bf16.mxu0 %v3571_v1  ;;  %v1898_v33 = vor.u32 %v1897_v38, %v1894_v29 }
 0x4a2   :  { %v1697_v5 = vshll.u32 %v4100_v3, 16  ;;  %v1701_v6 = vshrl.u32 %v4100_v3, 16  ;;  %1333 = vrot.lane.b32.xlu1 %v2874_v63, %s3644_s9  ;;  %1331 = vrot.lane.b32.xlu0 %v2873_v0, %s3644_s9  ;;  %v1881_v8 = vshrl.u32 %v4094_v60, 16  ;;  %v1690_v13 = vrot.slane %v1688_v43, 4  ;;  %v3577_v2 = vld [vmem:[%s4414_s4 + $0xd8] sm:$0xff]  }
 0x4a3   :  { %v4108_v12 = vld [vmem:[#allocation3 + $0x20] sm:$0xff]  ;;  %v1693_v15 = vrot.slane %v1691_v4, 5  ;;  %v1879_v22 = vrot.slane %v1877_v7, 5  ;;  %v1875_v58 = vrot.slane %v1874_v49, 4  ;;  %v1684_v61 = vld [vmem:[#allocation3 + $0x18] sm:$0xf] }
 0x4a4   :  { %v2876_v23 = vcombine.high %v1268_v28, %v4108_v12  ;;  %v2875_v17 = vcombine.low %v1268_v28, %v4108_v12  ;;  %v3573_v14 = vld [vmem:[#allocation3 + $0x18] ss:$8 sps:$4 sm:$0xff]   ;;  %v1699_v16 = vrot.slane %v1697_v5, 5  ;;  %v1703_v21 = vrot.slane %v1701_v6, 4 }
 0x4a5   :  { %v1883_v24 = vrot.slane %v1881_v8, 4  ;;  %v1901_v26 = vshll.u32 %v4108_v12, 16  ;;  %v1694_v27 = vor.u32 %v1693_v15, %v1690_v13  ;;  %v1905_v30 = vshrl.u32 %v4108_v12, 16  ;;  %3372 = vmatmul.mubr.bf16.vlgmr.msra.gmra.mxu0 %v3573_v14  ;;  %v2187_v5 = vld [vmem:[#allocation3] sm:$0xe] }
 0x4a6   :  { %1337 = vrot.lane.b32.xlu1 %v2876_v23, %s3644_s9  ;;  %1335 = vrot.lane.b32.xlu0 %v2875_v17, %s3644_s9  ;;  %v1704_v34 = vor.u32 %v1703_v21, %v1699_v16  ;;  %v1880_v62 = vsel %vm3787_vm13, %v1875_v58, %v1879_v22  ;;  %v1899_v43 = vrot.slane %v1898_v33, 4  ;;  %v1712_v7 = vshrl.u32 %v1684_v61, 16  ;;  %v2188_v10 = vld [vmem:[#allocation3 + $0x18] sm:$0xe]  ;;  %v2335_v38 = vld [vmem:[#allocation3] sm:$0xee] }
 0x4a7   :  { %v4119_v32 = vld [vmem:[#allocation3 + $0x10] sm:$0x1]  ;;  %v1884_v37 = vor.u32 %v1883_v24, %v1879_v22  ;;  %v1903_v39 = vrot.slane %v1901_v26, 5  ;;  %3396 = vmatpush3.bf16.msra.mxu0 %v4003_v9  ;;  %v1695_v40 = vrot.slane %v1694_v27, 4  ;;  %v1907_v46 = vrot.slane %v1905_v30, 4  ;;  %v3578_v26 = vld [vmem:[%s4414_s4 + $0xd0] sm:$0xff]  }
 0x4a8   :  { %v4121_v36 = vld [vmem:[#allocation3 + $0x10] sm:$0x11]  ;;  %v1707_v41 = vshll.u32 %v4119_v32, 16  ;;  %v4126_v45 = vld [vmem:[#allocation3 + $0x28] sm:$0x11]  ;;  %3397 = vmatprep.subr.bf16.mxu0 %v3574_v19  ;;  %v1705_v9 = vrot.slane %v1704_v34, 4 }
 0x4a9   :  { %v1887_v42 = vshll.u32 %v4121_v36, 16  ;;  %v1911_v50 = vshll.u32 %v4126_v45, 16  ;;  %v1908_v52 = vor.u32 %v1907_v46, %v1903_v39  ;;  %v1885_v53 = vrot.slane %v1884_v37, 4  ;;  %v1686_v6 = vld [vmem:[#allocation3 + $0x28] sm:$0x1] }
 0x4aa   :  { %1569 = vrot.lane.b32.xlu1 %v2874_v63, %s3650_s16  ;;  %1567 = vrot.lane.b32.xlu0 %v2873_v0, %s3650_s16  ;;  %v1709_v28 = vrot.slane %v1707_v41, 5  ;;  %v1700_v31 = vsel %vm3787_vm13, %v1695_v40, %v1699_v16  ;;  %v1685_v63 = vld [vmem:[#allocation3 + $0x20] sm:$0xf]  ;;  %v1715_v8 = vshll.u32 %v1684_v61, 16  ;;  %v1904_v11 = vsel %vm3787_vm13, %v1899_v43, %v1903_v39  ;;  %v2336_v33 = vld [vmem:[#allocation3 + $0x18] sm:$0xee] }
 0x4ab   :  { %v1889_v51 = vrot.slane %v1887_v42, 5  ;;  %3398 = vmatpush3.bf16.msra.mxu0 %v3574_v19  ;;  %v1909_v35 = vrot.slane %v1908_v52, 4  ;;  %v1913_v55 = vrot.slane %v1911_v50, 5  ;;  %v1721_v13 = vshll.u32 %v1685_v63, 16 }
 0x4ac   :  { %v1710_v54 = vsel %vm3787_vm13, %v1705_v9, %v1709_v28  ;;  %3399 = vmatprep.subr.bf16.mxu0 %v3575_v47  ;;  %v2997_v15 = vrot.slane %v2187_v5, 9  ;;  %v2197_v16 = vrot.slane %v4100_v3, 5  ;;  %v2200_v19 = vrot.slane %v4119_v32, 5  ;;  %v3590_v5 = vld [vmem:[%s4414_s4 + $0x170] sm:$0xff]  }
 0x4ad   :  { %v2935_v56 = vcombine.low %v1700_v31, %v1710_v54  ;;  %v1890_v59 = vsel %vm3787_vm13, %v1885_v53, %v1889_v51  ;;  %v1914_v4 = vsel %vm3787_vm13, %v1909_v35, %v1913_v55  ;;  %v2998_v21 = vrot.slane %v2188_v10, 9  ;;  %v3602_v10 = vld [vmem:[%s4414_s4 + $0x140] sm:$0xff]  }
 0x4ae   :  { %1573 = vrot.lane.b32.xlu1 %v2876_v23, %s3650_s16  ;;  %1571 = vrot.lane.b32.xlu0 %v2875_v17, %s3650_s16  ;;  %v2962_v0 = vcombine.high %v1880_v62, %v1890_v59  ;;  %v2961_v1 = vcombine.low %v1880_v62, %v1890_v59  ;;  %v1725_v23 = vshrl.u32 %v1685_v63, 16  ;;  %v2964_v17 = vcombine.high %v1904_v11, %v1914_v4 }
 0x4af   :  { %3411 = vmatprep.mubr.bf16.mxu0 %v2935_v56  ;;  %3400 = vmatpush3.bf16.msra.mxu0 %v3575_v47  ;;  %v2963_v14 = vcombine.low %v1904_v11, %v1914_v4  ;;  %v2204_v22 = vrot.slane %v1685_v63, 5  ;;  %v2207_v24 = vrot.slane %v1686_v6, 5  ;;  %v1714_v27 = vrot.slane %v1712_v7, 4  ;;  %v3598_v7 = vld [vmem:[%s4414_s4 + $0x150] sm:$0xff]   ;;  %v3604_v11 = vld [vmem:[%s4414_s4 + $0x1f8] sm:$0xff]  }
 0x4b0   :  { %3401 = vmatprep.subr.bf16.mxu0 %v3576_v57  ;;  %v1717_v29 = vrot.slane %v1715_v8, 5  ;;  %v1723_v30 = vrot.slane %v1721_v13, 5  ;;  %v1727_v34 = vrot.slane %v1725_v23, 4  ;;  %v2199_v3 = vrot.slane %v2197_v16, 4  ;;  %v3600_v8 = vld [vmem:[%s4414_s4 + $0x148] sm:$0xff]  }
 0x4b1   :  { %v2206_v37 = vrot.slane %v2204_v22, 4  ;;  %v2345_v32 = vrot.slane %v4094_v60, 5  ;;  %v4168_v39 = vsel %vm3812_vm1, %v2997_v15, %v2197_v16  ;;  %v4176_v41 = vsel %vm3812_vm1, %v2998_v21, %v2204_v22  ;;  %v3579_v60 = vld [vmem:[%s4414_s4 + $0xc8] sm:$0xff]   ;;  %v3593_v16 = vld [vmem:[%s4414_s4 + $0xb0] sm:$0xff]  }
 0x4b2   :  { %1946 = vrot.lane.b32.xlu1 %v2962_v0, %s3644_s9  ;;  %1944 = vrot.lane.b32.xlu0 %v2961_v1, %s3644_s9  ;;  %v4172_v40 = vsel %vm3812_vm1, %v2199_v3, %v2200_v19  ;;  %v2348_v46 = vrot.slane %v4121_v36, 5  ;;  %v1718_v50 = vor.u32 %v1717_v29, %v1714_v27  ;;  %v1728_v9 = vor.u32 %v1727_v34, %v1723_v30  ;;  %v3580_v36 = vld [vmem:[%s4414_s4 + $0xc0] sm:$0xff]   ;;  %v3599_v3 = vld [vmem:[%s4414_s4 + $0x98] sm:$0xff]  }
 0x4b3   :  { %3402 = vmatpush3.bf16.msra.mxu0 %v3576_v57  ;;  %v4180_v42 = vsel %vm3812_vm1, %v2206_v37, %v2207_v24  ;;  %v3015_v47 = vcombine.low %v4168_v39, %v4172_v40  ;;  %v1731_v28 = vshll.u32 %v1686_v6, 16  ;;  %v3025_v51 = vrot.slane %v2335_v38, 9  ;;  %v3596_v6 = vld [vmem:[%s4414_s4 + $0x158] sm:$0xff]   ;;  %v3595_v24 = vld [vmem:[%s4414_s4 + $0xa8] sm:$0xff]   ;;  %v3601_v38 = vld [vmem:[%s4414_s4 + $0x90] sm:$0xff]  }
 0x4b4   :  { %3403 = vmatprep.subr.bf16.mxu0 %v3577_v2  ;;  %v3016_v49 = vcombine.low %v4176_v41, %v4180_v42  ;;  %v2347_v52 = vrot.slane %v2345_v32, 4  ;;  %v2352_v53 = vrot.slane %v4108_v12, 5  ;;  %v2355_v54 = vrot.slane %v4126_v45, 5  ;;  %v3588_v45 = vld [vmem:[%s4414_s4 + $0x178] sm:$0xff]   ;;  %v3626_v39 = vld [vmem:[%s4414_s4 + $0x190] sm:$0xff]   ;;  %v3627_v40 = vld [vmem:[%s4414_s4 + $0x188] sm:$0xff]  }
 0x4b5   :  { %v1719_v35 = vrot.slane %v1718_v50, 4  ;;  %v1729_v55 = vrot.slane %v1728_v9, 4  ;;  %v1733_v56 = vrot.slane %v1731_v28, 5  ;;  %v2346_v12 = vsel %vm3812_vm1, %v3025_v51, %v2345_v32  ;;  %v3603_v50 = vld [vmem:[%s4414_s4 + $0x88] sm:$0xff]   ;;  %v3633_v41 = vld [vmem:[%s4414_s4 + $0x218] sm:$0xff]   ;;  %v3634_v42 = vld [vmem:[%s4414_s4 + $0x210] sm:$0xff]  }
 0x4b6   :  { %1950 = vrot.lane.b32.xlu1 %v2964_v17, %s3644_s9  ;;  %1948 = vrot.lane.b32.xlu0 %v2963_v14, %s3644_s9  ;;  %v2349_v31 = vsel %vm3812_vm1, %v2347_v52, %v2348_v46  ;;  %v3026_v57 = vrot.slane %v2336_v33, 9  ;;  %v2354_v58 = vrot.slane %v2352_v53, 4  ;;  %v3605_v52 = vld [vmem:[%s4414_s4 + $0x80] sm:$0xff]  }
 0x4b7   :  { %3404 = vmatpush3.bf16.msra.mxu0 %v3577_v2  ;;  %v3044_v59 = vcombine.high %v2346_v12, %v2349_v31  ;;  %v3043_v61 = vcombine.low %v2346_v12, %v2349_v31  ;;  %v1724_v63 = vsel %vm3787_vm13, %v1719_v35, %v1723_v30  ;;  %v3597_v30 = vld [vmem:[%s4414_s4 + $0xa0] sm:$0xff]   ;;  %v3608_v35 = vld [vmem:[%s4414_s4 + $0x1e8] sm:$0xff]  }
 0x4b8   :  { %3405 = vmatprep.subr.bf16.mxu0 %v3578_v26  ;;  %v2356_v62 = vsel %vm3812_vm1, %v2354_v58, %v2355_v54  ;;  %v3607_v54 = vld [vmem:[%s4414_s4 + $0x138] sm:$0xff]  }
 0x4ba   :  { %2076 = vrot.lane.b32.xlu1 %v2962_v0, %s3650_s16  ;;  %2074 = vrot.lane.b32.xlu0 %v2961_v1, %s3650_s16  ;;  %v1734_v0 = vsel %vm3787_vm13, %v1729_v55, %v1733_v56  ;;  %v2353_v1 = vsel %vm3812_vm1, %v3026_v57, %v2352_v53  ;;  %vm1339_vm13 = vcmask 982016   ;;  %vm1575_vm1 = vcmask 916480   ;;  %v3606_v53 = vld [vmem:[%s4414_s4 + $0x1f0] sm:$0xff]   ;;  %v3610_v57 = vld [vmem:[%s4414_s4 + $0x1e0] sm:$0xff]  }
 0x4bb   :  { %3406 = vmatpush3.bf16.msra.mxu0 %v3578_v26  ;;  %v3046_v2 = vcombine.high %v2353_v1, %v2356_v62  ;;  %v3045_v43 = vcombine.low %v2353_v1, %v2356_v62  ;;  %v2936_v4 = vcombine.low %v1724_v63, %v1734_v0  ;;  %v3609_v56 = vld [vmem:[%s4414_s4 + $0x130] sm:$0xff]   ;;  %v3613_v62 = vld [vmem:[%s4414_s4 + $0x120] sm:$0xff]   ;;  %v3615_v63 = vld [vmem:[%s4414_s4 + $0x118] sm:$0xff]  }
 0x4bc   :  { %3407 = vmatprep.subr.bf16.mxu0 %v3579_v60  ;;  %v3616_v0 = vld [vmem:[%s4414_s4 + $0x1c8] sm:$0xff]   ;;  %v3617_v1 = vld [vmem:[%s4414_s4 + $0x110] sm:$0xff]  }
 0x4be   :  { %2080 = vrot.lane.b32.xlu1 %v2964_v17, %s3650_s16  ;;  %2078 = vrot.lane.b32.xlu0 %v2963_v14, %s3650_s16 }
 0x4bf   :  { %3408 = vmatpush3.bf16.msra.mxu0 %v3579_v60 }
 0x4c0   :  { %3409 = vmatprep.subr.bf16.mxu0 %v3580_v36 }
 0x4c2   :  { %2388 = vrot.lane.b32.xlu1 %v3044_v59, %s3644_s9  ;;  %2386 = vrot.lane.b32.xlu0 %v3043_v61, %s3644_s9 }
 0x4c3   :  { %3410 = vmatpush3.bf16.msra.mxu0 %v3580_v36 }
 0x4c4   :  { %3435 = vmatprep.subr.bf16.mxu0 %v3588_v45 }
 0x4c6   :  { %2392 = vrot.lane.b32.xlu1 %v3046_v2, %s3644_s9  ;;  %2390 = vrot.lane.b32.xlu0 %v3045_v43, %s3644_s9 }
 0x4c7   :  { %3412 = vmatmul.mubr.bf16.vlgmr.msra.gmra.mxu0 %v2936_v4 }
 0x4c8   :  { %3436 = vmatpush3.bf16.msra.mxu0 %v3588_v45  ;;  %v3614_v45 = vld [vmem:[%s4414_s4 + $0x1d0] sm:$0xff]  }
 0x4c9   :  { %3437 = vmatprep.subr.bf16.mxu0 %v3590_v5 }
 0x4ca   :  { %2518 = vrot.lane.b32.xlu1 %v3044_v59, %s3650_s16  ;;  %2516 = vrot.lane.b32.xlu0 %v3043_v61, %s3650_s16  ;;  %v3611_v59 = vld [vmem:[%s4414_s4 + $0x128] sm:$0xff]   ;;  %v3612_v61 = vld [vmem:[%s4414_s4 + $0x1d8] sm:$0xff]  }
 0x4cc   :  { %3438 = vmatpush3.bf16.msra.mxu0 %v3590_v5 }
 0x4cd   :  { %3439 = vmatprep.subr.bf16.mxu0 %v3592_v20 }
 0x4ce   :  { %2522 = vrot.lane.b32.xlu1 %v3046_v2, %s3650_s16  ;;  %2520 = vrot.lane.b32.xlu0 %v3045_v43, %s3650_s16  ;;  %v3618_v2 = vld [vmem:[%s4414_s4 + $0x1c0] sm:$0xff]   ;;  %v3619_v43 = vld [vmem:[%s4414_s4 + $0x108] sm:$0xff]  }
 0x4d0   :  { %3440 = vmatpush3.bf16.msra.mxu0 %v3592_v20  ;;  %v3620_v20 = vld [vmem:[%s4414_s4 + $0x100] sm:$0xff]  }
 0x4d1   :  { %3441 = vmatprep.subr.bf16.mxu0 %v3594_v44 }
 0x4d4   :  { %3442 = vmatpush3.bf16.msra.mxu0 %v3594_v44 }
 0x4d5   :  { %3443 = vmatprep.subr.bf16.mxu0 %v3596_v6 }
 0x4d8   :  { %3444 = vmatpush3.bf16.msra.mxu0 %v3596_v6  ;;  %v3621_v6 = vld [vmem:[%s4414_s4 + $0x1b8] sm:$0xff]  }
 0x4d9   :  { %3445 = vmatprep.subr.bf16.mxu0 %v3598_v7 }
 0x4dc   :  { %3446 = vmatpush3.bf16.msra.mxu0 %v3598_v7  ;;  %v3622_v7 = vld [vmem:[%s4414_s4 + $0x1b0] sm:$0xff]  }
 0x4dd   :  { %3447 = vmatprep.subr.bf16.mxu0 %v3600_v8 }
 0x4e0   :  { %3448 = vmatpush3.bf16.msra.mxu0 %v3600_v8 }
 0x4e1   :  { %3449 = vmatprep.subr.bf16.mxu0 %v3602_v10 }
 0x4e4   :  { %3450 = vmatpush3.bf16.msra.mxu0 %v3602_v10  ;;  %v3623_v10 = vld [vmem:[%s4414_s4 + $0x1a8] sm:$0xff]  }
 0x4e5   :  { %3475 = vmatprep.subr.bf16.mxu0 %v3604_v11 }
 0x514   :  { %v1334_v13 = vpop.permute.xlu1 %1333  ;;  %v1332_v23 = vpop.permute.xlu0 %1331 }
 0x515   :  { %v1340_v17 = vsel %vm1339_vm13, %v1332_v23, %v1334_v13  ;;  %v3625_v13 = vld [vmem:[%s4414_s4 + $0x198] sm:$0xff]  }
 0x516   :  { %3351 = vmatprep.mubr.bf16.mxu1 %v1340_v17  ;;  %v3629_v23 = vld [vmem:[%s4414_s4 + $0x238] sm:$0xff]  }
 0x518   :  { %v1338_v14 = vpop.permute.xlu1 %1337  ;;  %v1336_v15 = vpop.permute.xlu0 %1335 }
 0x519   :  { %v1341_v19 = vsel %vm1339_vm13, %v1336_v15, %v1338_v14  ;;  %v3630_v15 = vld [vmem:[%s4414_s4 + $0x230] sm:$0xff]  }
 0x51a   :  { %3352 = vmatmul.mubr.bf16.vlgmr.msra.gmra.mxu1 %v1341_v19  ;;  %v3631_v19 = vld [vmem:[%s4414_s4 + $0x228] sm:$0xff]  }
 0x51b   :  { %3376 = vmatpush3.bf16.msra.mxu1 %v4074_v48 }
 0x51c   :  { %v1570_v21 = vpop.permute.xlu1 %1569  ;;  %v1568_v22 = vpop.permute.xlu0 %1567  ;;  %3377 = vmatprep.subr.bf16.mxu1 %v3593_v16 }
 0x51d   :  { %v1576_v26 = vsel %vm1575_vm1, %v1568_v22, %v1570_v21  ;;  %v3632_v21 = vld [vmem:[%s4414_s4 + $0x220] sm:$0xff]  }
 0x51e   :  { %3391 = vmatprep.mubr.bf16.mxu1 %v1576_v26  ;;  %v3636_v22 = vld [vmem:[%s4414_s4 + $0x200] sm:$0xff]  }
 0x51f   :  { %3378 = vmatpush3.bf16.msra.mxu1 %v3593_v16 }
 0x520   :  { %v1574_v27 = vpop.permute.xlu1 %1573  ;;  %v1572_v29 = vpop.permute.xlu0 %1571  ;;  %3379 = vmatprep.subr.bf16.mxu1 %v3595_v24 }
 0x521   :  { %v1577_v12 = vsel %vm1575_vm1, %v1572_v29, %v1574_v27 }
 0x523   :  { %3380 = vmatpush3.bf16.msra.mxu1 %v3595_v24 }
 0x524   :  { %v1947_v48 = vpop.permute.xlu1 %1946  ;;  %v1945_v34 = vpop.permute.xlu0 %1944  ;;  %3381 = vmatprep.subr.bf16.mxu1 %v3597_v30 }
 0x525   :  { %v1952_v58 = vsel %vm1339_vm13, %v1945_v34, %v1947_v48 }
 0x527   :  { %3382 = vmatpush3.bf16.msra.mxu1 %v3597_v30 }
 0x528   :  { %v4262_v37 = vpop.permute.xlu1 %1950  ;;  %v4264_v32 = vpop.permute.xlu0 %1948  ;;  %3383 = vmatprep.subr.bf16.mxu1 %v3599_v3 }
 0x529   :  { %v1953_v8 = vsel %vm1339_vm13, %v4264_v32, %v4262_v37 }
 0x52b   :  { %3384 = vmatpush3.bf16.msra.mxu1 %v3599_v3 }
 0x52c   :  { %v2077_v60 = vpop.permute.xlu1 %2076  ;;  %v2075_v46 = vpop.permute.xlu0 %2074  ;;  %3385 = vmatprep.subr.bf16.mxu1 %v3601_v38 }
 0x52d   :  { %v2082_v9 = vsel %vm1575_vm1, %v2075_v46, %v2077_v60 }
 0x52e   :  { %3451 = vmatprep.mubr.bf16.mxu0 %v2082_v9 }
 0x52f   :  { %3386 = vmatpush3.bf16.msra.mxu1 %v3601_v38 }
 0x530   :  { %v2081_v28 = vpop.permute.xlu1 %2080  ;;  %v2079_v51 = vpop.permute.xlu0 %2078  ;;  %3387 = vmatprep.subr.bf16.mxu1 %v3603_v50 }
 0x531   :  { %v2083_v33 = vsel %vm1575_vm1, %v2079_v51, %v2081_v28 }
 0x532   :  { %3452 = vmatmul.mubr.bf16.vlgmr.msra.gmra.mxu0 %v2083_v33 }
 0x533   :  { %3388 = vmatpush3.bf16.msra.mxu1 %v3603_v50  ;;  %3476 = vmatpush3.bf16.msra.mxu0 %v3604_v11  ;;  %v3624_v11 = vld [vmem:[%s4414_s4 + $0x1a0] sm:$0xff]  }
 0x534   :  { %v2389_v36 = vpop.permute.xlu1 %2388  ;;  %v2387_v31 = vpop.permute.xlu0 %2386  ;;  %3389 = vmatprep.subr.bf16.mxu1 %v3605_v52  ;;  %3477 = vmatprep.subr.bf16.mxu0 %v3606_v53 }
 0x535   :  { %v2394_v55 = vsel %vm1339_vm13, %v2387_v31, %v2389_v36 }
 0x536   :  { %3491 = vmatprep.mubr.bf16.mxu0 %v2394_v55 }
 0x537   :  { %3390 = vmatpush3.bf16.msra.mxu1 %v3605_v52  ;;  %3478 = vmatpush3.bf16.msra.mxu0 %v3606_v53 }
 0x538   :  { %3415 = vmatprep.subr.bf16.mxu1 %v3607_v54  ;;  %3479 = vmatprep.subr.bf16.mxu0 %v3608_v35  ;;  %v2393_v4 = vpop.permute.xlu1 %2392  ;;  %v2391_v5 = vpop.permute.xlu0 %2390 }
 0x539   :  { %v2395_v44 = vsel %vm1339_vm13, %v2391_v5, %v2393_v4 }
 0x53a   :  { %3392 = vmatmul.mubr.bf16.vlgmr.msra.gmra.mxu1 %v1577_v12 }
 0x53b   :  { %3416 = vmatpush3.bf16.msra.mxu1 %v3607_v54  ;;  %3431 = vmatprep.mubr.bf16.mxu1 %v1952_v58 }
 0x53c   :  { %3480 = vmatpush3.bf16.msra.mxu0 %v3608_v35  ;;  %3417 = vmatprep.subr.bf16.mxu1 %v3609_v56  ;;  %v2519_v17 = vpop.permute.xlu1 %2518  ;;  %v2517_v14 = vpop.permute.xlu0 %2516 }
 0x53d   :  { %3481 = vmatprep.subr.bf16.mxu0 %v3610_v57  ;;  %v2524_v16 = vsel %vm1575_vm1, %v2517_v14, %v2519_v17 }
 0x53f   :  { %3418 = vmatpush3.bf16.msra.mxu1 %v3609_v56 }
 0x540   :  { %3482 = vmatpush3.bf16.msra.mxu0 %v3610_v57  ;;  %3419 = vmatprep.subr.bf16.mxu1 %v3611_v59  ;;  %v2523_v24 = vpop.permute.xlu1 %2522  ;;  %v2521_v26 = vpop.permute.xlu0 %2520 }
 0x541   :  { %3483 = vmatprep.subr.bf16.mxu0 %v3612_v61  ;;  %v2525_v27 = vsel %vm1575_vm1, %v2521_v26, %v2523_v24 }
 0x543   :  { %3420 = vmatpush3.bf16.msra.mxu1 %v3611_v59 }
 0x544   :  { %3484 = vmatpush3.bf16.msra.mxu0 %v3612_v61  ;;  %3421 = vmatprep.subr.bf16.mxu1 %v3613_v62 }
 0x545   :  { %3485 = vmatprep.subr.bf16.mxu0 %v3614_v45 }
 0x547   :  { %3422 = vmatpush3.bf16.msra.mxu1 %v3613_v62 }
 0x548   :  { %3486 = vmatpush3.bf16.msra.mxu0 %v3614_v45  ;;  %3423 = vmatprep.subr.bf16.mxu1 %v3615_v63 }
 0x549   :  { %3487 = vmatprep.subr.bf16.mxu0 %v3616_v0 }
 0x54b   :  { %3424 = vmatpush3.bf16.msra.mxu1 %v3615_v63 }
 0x54c   :  { %3488 = vmatpush3.bf16.msra.mxu0 %v3616_v0  ;;  %3425 = vmatprep.subr.bf16.mxu1 %v3617_v1 }
 0x54d   :  { %3489 = vmatprep.subr.bf16.mxu0 %v3618_v2 }
 0x54f   :  { %3426 = vmatpush3.bf16.msra.mxu1 %v3617_v1 }
 0x550   :  { %3490 = vmatpush3.bf16.msra.mxu0 %v3618_v2  ;;  %3427 = vmatprep.subr.bf16.mxu1 %v3619_v43 }
 0x553   :  { %3492 = vmatmul.mubr.bf16.vlgmr.msra.gmra.mxu0 %v2395_v44  ;;  %3428 = vmatpush3.bf16.msra.mxu1 %v3619_v43 }
 0x554   :  { %3429 = vmatprep.subr.bf16.mxu1 %v3620_v20 }
 0x557   :  { %3430 = vmatpush3.bf16.msra.mxu1 %v3620_v20 }
 0x558   :  { %3455 = vmatprep.subr.bf16.mxu1 %v3621_v6 }
 0x55a   :  { %3432 = vmatmul.mubr.bf16.vlgmr.msra.gmra.mxu1 %v1953_v8 }
 0x55b   :  { %3456 = vmatpush3.bf16.msra.mxu1 %v3621_v6  ;;  %3471 = vmatprep.mubr.bf16.mxu1 %v3015_v47  ;;  %v3628_v47 = vld [vmem:[%s4414_s4 + $0x180] sm:$0xff]  }
 0x55c   :  { %3457 = vmatprep.subr.bf16.mxu1 %v3622_v7 }
 0x55f   :  { %3458 = vmatpush3.bf16.msra.mxu1 %v3622_v7 }
 0x560   :  { %3459 = vmatprep.subr.bf16.mxu1 %v3623_v10 }
 0x563   :  { %3460 = vmatpush3.bf16.msra.mxu1 %v3623_v10 }
 0x564   :  { %3461 = vmatprep.subr.bf16.mxu1 %v3624_v11 }
 0x565   :  { %v3373_v48 = vpop.f32.mrf.mxu0 }
 0x567   :  { %3462 = vmatpush3.bf16.msra.mxu1 %v3624_v11  ;;  %v1535_v3 = vpop.f32.mrf.mxu0 }
 0x568   :  { %3463 = vmatprep.subr.bf16.mxu1 %v3625_v13 }
 0x569   :  { %v3374_v32 = vpop.f32.mrf.mxu0 }
 0x56b   :  { %3464 = vmatpush3.bf16.msra.mxu1 %v3625_v13  ;;  %v1538_v60 = vpop.f32.mrf.mxu0 }
 0x56c   :  { %3465 = vmatprep.subr.bf16.mxu1 %v3626_v39 }
 0x56f   :  { %3466 = vmatpush3.bf16.msra.mxu1 %v3626_v39 }
 0x570   :  { %3467 = vmatprep.subr.bf16.mxu1 %v3627_v40 }
 0x573   :  { %3468 = vmatpush3.bf16.msra.mxu1 %v3627_v40 }
 0x574   :  { %3469 = vmatprep.subr.bf16.mxu1 %v3628_v47 }
 0x577   :  { %3470 = vmatpush3.bf16.msra.mxu1 %v3628_v47 }
 0x578   :  { %3495 = vmatprep.subr.bf16.mxu1 %v3629_v23 }
 0x57a   :  { %3472 = vmatmul.mubr.bf16.vlgmr.msra.gmra.mxu1 %v3016_v49  ;;  %v3635_v49 = vld [vmem:[%s4414_s4 + $0x208] sm:$0xff]  }
 0x57b   :  { %3496 = vmatpush3.bf16.msra.mxu1 %v3629_v23  ;;  %3511 = vmatprep.mubr.bf16.mxu1 %v2524_v16 }
 0x57c   :  { %3497 = vmatprep.subr.bf16.mxu1 %v3630_v15 }
 0x57f   :  { %3498 = vmatpush3.bf16.msra.mxu1 %v3630_v15 }
 0x580   :  { %3499 = vmatprep.subr.bf16.mxu1 %v3631_v19 }
 0x583   :  { %3500 = vmatpush3.bf16.msra.mxu1 %v3631_v19 }
 0x584   :  { %3501 = vmatprep.subr.bf16.mxu1 %v3632_v21 }
 0x587   :  { %3502 = vmatpush3.bf16.msra.mxu1 %v3632_v21  ;;  %v3413_v50 = vpop.f32.mrf.mxu0 }
 0x588   :  { %3503 = vmatprep.subr.bf16.mxu1 %v3633_v41 }
 0x589   :  { %v1842_v28 = vpop.f32.mrf.mxu0 }
 0x58b   :  { %3504 = vmatpush3.bf16.msra.mxu1 %v3633_v41  ;;  %v3414_v52 = vpop.f32.mrf.mxu0 }
 0x58c   :  { %3505 = vmatprep.subr.bf16.mxu1 %v3634_v42 }
 0x58d   :  { %v1845_v33 = vpop.f32.mrf.mxu0 }
 0x58f   :  { %3506 = vmatpush3.bf16.msra.mxu1 %v3634_v42 }
 0x590   :  { %3507 = vmatprep.subr.bf16.mxu1 %v3635_v49 }
 0x593   :  { %3508 = vmatpush3.bf16.msra.mxu1 %v3635_v49 }
 0x594   :  { %3509 = vmatprep.subr.bf16.mxu1 %v3636_v22 }
 0x597   :  { %3510 = vmatpush3.bf16.msra.mxu1 %v3636_v22 }
 0x59a   :  { %3512 = vmatmul.mubr.bf16.vlgmr.msra.gmra.mxu1 %v2525_v27 }
 0x5da   :  { %v3353_v29 = vpop.f32.mrf.mxu1 }
 0x5db   :  { %v1544_v58 = vadd.f32 %v3373_v48, %v3353_v29 }
 0x5dc   :  { %v1426_v30 = vpop.f32.mrf.mxu1 }
 0x5dd   :  { %v1536_v56 = vadd.f32 %v1535_v3, %v1426_v30 }
 0x5de   :  { %v3354_v34 = vpop.f32.mrf.mxu1 }
 0x5df   :  { %v1547_v62 = vadd.f32 %v3374_v32, %v3354_v34 }
 0x5e0   :  { %v1429_v37 = vpop.f32.mrf.mxu1 }
 0x5e1   :  { %v1539_v59 = vadd.f32 %v1538_v60, %v1429_v37 }
 0x5f2   :  { %v3453_v31 = vpop.f32.mrf.mxu0 }
 0x5f4   :  { %v2168_v35 = vpop.f32.mrf.mxu0 }
 0x5f6   :  { %v3454_v12 = vpop.f32.mrf.mxu0 }
 0x5f8   :  { %v2171_v0 = vpop.f32.mrf.mxu0 }
 0x5fa   :  { %v3393_v38 = vpop.f32.mrf.mxu1 }
 0x5fb   :  { %v1679_v45 = vadd.f32 %v3393_v38, %v1544_v58 }
 0x5fc   :  { %v1662_v46 = vpop.f32.mrf.mxu1 }
 0x5fd   :  { %v1677_v61 = vadd.f32 %v1662_v46, %v1536_v56  ;;  %v1859_v5 = vadd.f32 %v3413_v50, %v1679_v45 }
 0x5fe   :  { %v3394_v9 = vpop.f32.mrf.mxu1 }
 0x5ff   :  { %v1680_v2 = vadd.f32 %v3394_v9, %v1547_v62  ;;  %v1857_v43 = vadd.f32 %v1842_v28, %v1677_v61 }
 0x600   :  { %v1665_v51 = vpop.f32.mrf.mxu1 }
 0x601   :  { %v1678_v63 = vadd.f32 %v1665_v51, %v1539_v59  ;;  %v1860_v8 = vadd.f32 %v3414_v52, %v1680_v2 }
 0x603   :  { %v1858_v44 = vadd.f32 %v1845_v33, %v1678_v63 }
 0x613   :  { %v3493_v4 = vpop.f32.mrf.mxu0 }
 0x615   :  { %v2480_v11 = vpop.f32.mrf.mxu0 }
 0x617   :  { %v3494_v14 = vpop.f32.mrf.mxu0 }
 0x619   :  { %v2483_v22 = vpop.f32.mrf.mxu0 }
 0x61a   :  { %v3433_v53 = vpop.f32.mrf.mxu1 }
 0x61b   :  { %v2055_v7 = vadd.f32 %v3433_v53, %v1859_v5 }
 0x61c   :  { %v2038_v36 = vpop.f32.mrf.mxu1 }
 0x61d   :  { %v2053_v20 = vadd.f32 %v2038_v36, %v1857_v43  ;;  %v2185_v47 = vadd.f32 %v3453_v31, %v2055_v7 }
 0x61e   :  { %v3434_v54 = vpop.f32.mrf.mxu1 }
 0x61f   :  { %v2056_v13 = vadd.f32 %v3434_v54, %v1860_v8  ;;  %v2183_v39 = vadd.f32 %v2168_v35, %v2053_v20 }
 0x620   :  { %v2041_v55 = vpop.f32.mrf.mxu1 }
 0x621   :  { %v2054_v10 = vadd.f32 %v2041_v55, %v1858_v44  ;;  %v2186_v19 = vadd.f32 %v3454_v12, %v2056_v13 }
 0x623   :  { %v2184_v17 = vadd.f32 %v2171_v0, %v2054_v10 }
 0x63a   :  { %v3473_v57 = vpop.f32.mrf.mxu1 }
 0x63b   :  { %v2333_v16 = vadd.f32 %v3473_v57, %v2185_v47 }
 0x63c   :  { %v2316_v1 = vpop.f32.mrf.mxu1 }
 0x63d   :  { %v2331_v23 = vadd.f32 %v2316_v1, %v2183_v39  ;;  %v2497_v26 = vadd.f32 %v3493_v4, %v2333_v16 }
 0x63e   :  { %v3474_v6 = vpop.f32.mrf.mxu1 }
 0x63f   :  { %v2334_v42 = vadd.f32 %v3474_v6, %v2186_v19  ;;  %v2495_v49 = vadd.f32 %v2480_v11, %v2331_v23 }
 0x640   :  { %v2319_v40 = vpop.f32.mrf.mxu1 }
 0x641   :  { %v2332_v21 = vadd.f32 %v2319_v40, %v2184_v17  ;;  %v2498_v34 = vadd.f32 %v3494_v14, %v2334_v42  ;;  %v2629_v40 = vld [vmem:[%s4417_s5] sm:$0x1] }
 0x642   :  { %v2630_v17 = vld [vmem:[%s4418_s6] sm:$0x1] }
 0x643   :  { %v2496_v29 = vadd.f32 %v2483_v22, %v2332_v21 }
 0x65a   :  { %v3513_v15 = vpop.f32.mrf.mxu1 }
 0x65b   :  { %v2627_v48 = vadd.f32 %v3513_v15, %v2497_v26 }
 0x65c   :  { %v2610_v41 = vpop.f32.mrf.mxu1 }
 0x65d   :  { %v2625_v27 = vadd.f32 %v2610_v41, %v2495_v49  ;;  %v2642_v46 = vmul.f32 %v2627_v48, %v2627_v48 }
 0x65e   :  { %v3514_v24 = vpop.f32.mrf.mxu1 }
 0x65f   :  { %v2640_v37 = vmul.f32 %v2625_v27, %v2625_v27  ;;  %v2628_v32 = vadd.f32 %v3514_v24, %v2498_v34 }
 0x660   :  { %v2613_v30 = vpop.f32.mrf.mxu1 }
 0x661   :  { %v2626_v3 = vadd.f32 %v2613_v30, %v2496_v29  ;;  %v2643_v28 = vmul.f32 %v2628_v32, %v2628_v32 }
 0x663   :  { %v2631_v38 = vadd.f32 %v2626_v3, %v2625_v27  ;;  %v2641_v60 = vmul.f32 %v2626_v3, %v2626_v3 }
 0x665   :  { %v2632_v50 = vadd.f32 %v2631_v38, %v2627_v48  ;;  %v2644_v9 = vadd.f32 %v2641_v60, %v2640_v37 }
 0x667   :  { %v2633_v51 = vadd.f32 %v2632_v50, %v2628_v32  ;;  %v2645_v52 = vadd.f32 %v2644_v9, %v2642_v46 }
 0x669   :  { %v2634_v53 = vrot.slane %v2633_v51, 4  ;;  %v2646_v33 = vadd.f32 %v2645_v52, %v2643_v28 }
 0x66b   :  { %v2635_v36 = vadd.f32 %v2634_v53, %v2633_v51  ;;  %v2647_v31 = vrot.slane %v2646_v33, 4 }
 0x66d   :  { %v2636_v54 = vrot.slane %v2635_v36, 2  ;;  %v2648_v35 = vadd.f32 %v2647_v31, %v2646_v33 }
 0x66f   :  { %v2637_v55 = vadd.f32 %v2636_v54, %v2635_v36  ;;  %v2649_v56 = vrot.slane %v2648_v35, 2 }
 0x671   :  { %v2638_v12 = vrot.slane %v2637_v55, 1  ;;  %v2650_v57 = vadd.f32 %v2649_v56, %v2648_v35 }
 0x673   :  { %v2651_v58 = vrot.slane %v2650_v57, 1  ;;  %v2639_v59 = vadd.f32 %v2638_v12, %v2637_v55 }
 0x675   :  { %v2652_v61 = vadd.f32 %v2651_v58, %v2650_v57 }
 0x677   :  { %v2653_v62 = vsel %vm1090_vm2, %v2639_v59, %v2652_v61 }
 0x678   :  { %2654 = vrot.lane.b32.xlu0 %v2653_v62, %s3645_s1 }
 0x6ea   :  { %v2655_v45 = vpop.permute.xlu0 %2654 }
 0x6eb   :  { %v2656_v63 = vadd.f32 %v2655_v45, %v2653_v62 }
 0x6ed   :  { %2657 = vrot.lane.b32.xlu1 %v2656_v63, %s3646_s13 }
 0x75f   :  { %v2658_v0 = vpop.permute.xlu1 %2657 }
 0x760   :  { %v2659_v1 = vadd.f32 %v2658_v0, %v2656_v63 }
 0x762   :  { %2660 = vrot.lane.b32.xlu0 %v2659_v1, %s3647_s14 }
 0x7d4   :  { %v2661_v2 = vpop.permute.xlu0 %2660 }
 0x7d5   :  { %v2662_v43 = vadd.f32 %v2661_v2, %v2659_v1 }
 0x7d7   :  { %2663 = vrot.lane.b32.xlu1 %v2662_v43, %s3648_s15 }
 0x849   :  { %v2664_v4 = vpop.permute.xlu1 %2663 }
 0x84a   :  { %v2665_v5 = vadd.f32 %v2664_v4, %v2662_v43 }
 0x84c   :  { %v2666_v20 = vmul.f32 0.001953125, %v2665_v5 }
 0x84e   :  { %v2667_v44 = vmul.f32 %v2666_v20, %v2666_v20 }
 0x850   :  { %v2669_v6 = vrot.slane %v2667_v44, 7 }
 0x852   :  { %v2671_v7 = vsub.f32 %v2666_v20, %v2669_v6 }
 0x854   :  { %v2672_v8 = vmax.f32 %v2671_v7, 0.0 }
 0x856   :  { %v2673_v10 = vadd.f32 1e-05, %v2672_v8 }
 0x858   :  { %3639 = vrsqrt.f32 %v2673_v10 }
 0x865   :  { %v3640_v11 = vpop.eup %3639 }
 0x866   :  { %v2682_v13 = vrot.slane %v3640_v11, %v3966_v18 }
 0x868   :  { %v2683_v39 = vcombine.high %v2682_v13, %v2682_v13 }
 0x86a   :  { %v2690_v47 = vrot.slane %v2683_v39, %v3966_v18 }
 0x86c   :  { %v2692_v23 = vmul.f32 %v2690_v47, %v2629_v40 }
 0x86e   :  { %v2693_v14 = vmul.f32 %v2692_v23, %v2666_v20  ;;  %v2699_v15 = vrot.slane %v2692_v23, %v3972_v25 }
 0x870   :  { %v2694_v16 = vsub.f32 %v2630_v17, %v2693_v14  ;;  %v2701_v19 = vmul.f32 %v2699_v15, %v2625_v27  ;;  %v2702_v21 = vmul.f32 %v2699_v15, %v2626_v3  ;;  %v2703_v41 = vmul.f32 %v2699_v15, %v2627_v48 }
 0x871   :  { %v2704_v42 = vmul.f32 %v2699_v15, %v2628_v32 }
 0x872   :  { %v2709_v49 = vrot.slane %v2694_v16, %v3972_v25 }
 0x874   :  { %v2711_v22 = vadd.f32 %v2709_v49, %v2701_v19  ;;  %v2712_v24 = vadd.f32 %v2709_v49, %v2702_v21  ;;  %v2713_v26 = vadd.f32 %v2709_v49, %v2703_v41  ;;  %v2714_v29 = vadd.f32 %v2709_v49, %v2704_v42 }
 0x876   :  { %v2715_v18 = vmax.f32 %v2711_v22, 0.0  ;;  %v2716_v30 = vmax.f32 %v2712_v24, 0.0  ;;  %v2717_v34 = vmax.f32 %v2713_v26, 0.0  ;;  %v2718_v37 = vmax.f32 %v2714_v29, 0.0 }
 0x878   :  { %2719 = vst [vmem:[%s4419_s7] sm:$0xff] %v2715_v18  ;;  %2720 = vst [vmem:[%s4419_s7 + $0x8] sm:$0xff] %v2716_v30 }
 0x879   :  { %2721 = vst [vmem:[%s4419_s7 + $0x10] sm:$0xff] %v2717_v34  ;;  %2722 = vst [vmem:[%s4419_s7 + $0x18] sm:$0xff] %v2718_v37 }

</bundles_post_ra>
